<compile_context>
chip_gen: v7x
topology: tpu7x:2x2x1
jax: 0.10.0
libtpu: 0.0.40
codegen_flags: <defaults>
</compile_context>

<pallas_src>
import functools

import jax
import jax.numpy as jnp
from jax.experimental import pallas as pl
from jax.experimental.pallas import tpu as pltpu

LATENT = 128
BN_EPS = 1e-5
LRELU_SLOPE = 0.1

# Conservative VMEM budget for the bf16 activation cache (leaves headroom for the
# x / W / out pipeline buffers even on v7x's 64 MiB VMEM).
_ACT_CACHE_BUDGET_BYTES = 40 * 1024 * 1024


# ----------------------------------------------------------------------------
# Pallas kernel: multi-pass forward with in-kernel full-batch BN statistics.
# Grid = (pass, batch_tile); both axes sequential ("arbitrary").
# ----------------------------------------------------------------------------
def _text_latent_d_kernel(b_true, tb, mask_rows, use_cache,
                          x_ref, w_ref, vec_ref, o_ref,
                          stats_ref, act_ref=None):
    p = pl.program_id(0)            # pass index: 0..3
    i = pl.program_id(1)            # batch-tile index
    n_tiles = pl.num_programs(1)
    inv_b = jnp.float32(1.0 / b_true)

    def linear(h, layer):
        # MXU matmul: bf16 inputs, f32 accumulation. w_ref[layer] is (128,128) bf16
        # (pre-transposed to (in, out)); bias row is f32.
        w = w_ref[layer]
        b = vec_ref[layer:layer + 1, :]
        return jnp.dot(h.astype(jnp.bfloat16), w,
                       preferred_element_type=jnp.float32) + b

    def lrelu(h):
        return jnp.maximum(h, LRELU_SLOPE * h)

    def fold_bn(k):
        # Convert stat rows [2k, 2k+2) from (sum, sumsq) to (scale, shift) ONCE per
        # pass: scale = gamma*rsqrt(var+eps), shift = beta - mu*scale (training-mode
        # BatchNorm1d, biased one-pass variance clamped at 0).
        g = vec_ref[4 + k:5 + k, :]
        beta = vec_ref[7 + k:8 + k, :]
        mu = stats_ref[2 * k:2 * k + 1, :] * inv_b
        var = jnp.maximum(stats_ref[2 * k + 1:2 * k + 2, :] * inv_b - mu * mu, 0.0)
        scale = g * jax.lax.rsqrt(var + BN_EPS)
        shift = beta - mu * scale
        stats_ref[2 * k:2 * k + 2, :] = jnp.concatenate([scale, shift], axis=0)

    def bn_apply(h, k):
        # Stats rows already folded to (scale, shift) at i == 0 of this pass.
        scale = stats_ref[2 * k:2 * k + 1, :]
        shift = stats_ref[2 * k + 1:2 * k + 2, :]
        return h * scale + shift

    def accumulate(h, k):
        # Per-feature sum (row 2k) and sum-of-squares (row 2k+1) over the full batch,
        # excluding zero-padded rows (mask applied on the last tile only).
        @pl.when(i == 0)
        def _():
            stats_ref[2 * k:2 * k + 2, :] = jnp.zeros((2, LATENT), jnp.float32)

        def add(hm, hsq):
            stats_ref[2 * k:2 * k + 2, :] += jnp.concatenate(
                [jnp.sum(hm, axis=0, keepdims=True),
                 jnp.sum(hsq, axis=0, keepdims=True)], axis=0)

        if mask_rows:
            last = n_tiles - 1

            @pl.when(i == last)
            def _():
                row = jax.lax.broadcasted_iota(jnp.int32, (tb, 1), 0) + i * tb
                valid = (row < b_true).astype(jnp.float32)
                hm = h * valid
                add(hm, h * hm)

            @pl.when(i != last)
            def _():
                add(h, h * h)
        else:
            add(h, h * h)

    def head(h4):
        # Head (128 -> 1): VPU multiply + lane reduction (no N=1 MXU matmul).
        w5 = vec_ref[10:11, :]        # (1, 128) f32
        b5 = vec_ref[11:12, 0:1]      # (1, 1)   f32
        o_ref[...] = jnp.sum(h4 * w5, axis=-1, keepdims=True) + b5

    if use_cache:
        # ------- activation-cache path: x read once, 5 matmuls/row total -------
        a_slice = pl.ds(pl.multiple_of(i * tb, 16), tb)

        @pl.when(p == 0)
        def _():
            h1 = lrelu(linear(x_ref[...], 0))
            accumulate(h1, 0)
            act_ref[a_slice, :] = h1.astype(jnp.bfloat16)

        @pl.when(p == 1)
        def _():
            @pl.when(i == 0)
            def _():
                fold_bn(0)
            h = bn_apply(act_ref[a_slice, :].astype(jnp.float32), 0)
            h2 = lrelu(linear(h, 1))
            accumulate(h2, 1)
            act_ref[a_slice, :] = h2.astype(jnp.bfloat16)

        @pl.when(p == 2)
        def _():
            @pl.when(i == 0)
            def _():
                fold_bn(1)
            h = bn_apply(act_ref[a_slice, :].astype(jnp.float32), 1)
            h3 = lrelu(linear(h, 2))
            accumulate(h3, 2)
            act_ref[a_slice, :] = h3.astype(jnp.bfloat16)

        @pl.when(p == 3)
        def _():
            @pl.when(i == 0)
            def _():
                fold_bn(2)
            h = bn_apply(act_ref[a_slice, :].astype(jnp.float32), 2)
            head(lrelu(linear(h, 3)))
    else:
        # ------- fallback: recompute prefix from (bf16) x each pass -------
        x = x_ref[...]   # bf16; linear() casts are no-ops for the MXU feed

        @pl.when(p == 0)
        def _():
            accumulate(lrelu(linear(x, 0)), 0)

        @pl.when(p == 1)
        def _():
            @pl.when(i == 0)
            def _():
                fold_bn(0)
            h1 = lrelu(linear(x, 0))
            accumulate(lrelu(linear(bn_apply(h1, 0), 1)), 1)

        @pl.when(p == 2)
        def _():
            @pl.when(i == 0)
            def _():
                fold_bn(1)
            h1 = lrelu(linear(x, 0))
            h2 = lrelu(linear(bn_apply(h1, 0), 1))
            accumulate(lrelu(linear(bn_apply(h2, 1), 2)), 2)

        @pl.when(p == 3)
        def _():
            @pl.when(i == 0)
            def _():
                fold_bn(2)
            h1 = lrelu(linear(x, 0))
            h2 = lrelu(linear(bn_apply(h1, 0), 1))
            h3 = lrelu(linear(bn_apply(h2, 1), 2))
            head(lrelu(linear(bn_apply(h3, 2), 3)))


def _round_up(x, m):
    return ((x + m - 1) // m) * m


def text_latent_d_forward(x, params, *, tile_b=1024, force_no_cache=False):
    """x: (B, 128) float32 or bfloat16. Returns (B,) float32 (matches .view(-1))."""
    b, latent = x.shape
    assert latent == LATENT
    tile_b = max(int(tile_b), 16)
    # bf16 activations pack 16 rows per sublane tile -> round the batch tile to 16.
    tb = _round_up(min(tile_b, _round_up(b, 16)), 16)
    b_pad = _round_up(b, tb)
    num_tiles = b_pad // tb

    act_bytes = b_pad * LATENT * 2            # bf16 activation cache
    use_cache = (act_bytes <= _ACT_CACHE_BUDGET_BYTES) and not force_no_cache

    if not use_cache:
        # Fallback re-streams x 4x -> halve that HBM traffic by casting to bf16
        # (numerically identical: the matmul casts its LHS to bf16 anyway).
        x = x.astype(jnp.bfloat16)

    if b_pad != b:
        x = jnp.pad(x, ((0, b_pad - b), (0, 0)))

    kernel = functools.partial(_text_latent_d_kernel, b, tb, b_pad != b, use_cache)

    # stats scratch rows: 0-1 BN1, 2-3 BN2, 4-5 BN3 (sum/sumsq, folded to scale/shift).
    scratch = [pltpu.VMEM((8, LATENT), jnp.float32)]
    if use_cache:
        scratch.append(pltpu.VMEM((b_pad, LATENT), jnp.bfloat16))
        # After pass 0 no x tile is ever re-fetched (index pinned to the last block).
        x_index_map = lambda p, i: (jnp.where(p == 0, i, num_tiles - 1), 0)
        vmem_limit = min(act_bytes + 16 * 1024 * 1024, 56 * 1024 * 1024)
    else:
        x_index_map = lambda p, i: (i, 0)
        vmem_limit = 32 * 1024 * 1024

    out = pl.pallas_call(
        kernel,
        out_shape=jax.ShapeDtypeStruct((b_pad, 1), jnp.float32),
        grid_spec=pltpu.PrefetchScalarGridSpec(
            num_scalar_prefetch=0,
            grid=(4, num_tiles),                                          # (pass, batch tile)
            in_specs=[
                pl.BlockSpec((tb, LATENT), x_index_map),                    # x tile
                pl.BlockSpec((4, LATENT, LATENT), lambda p, i: (0, 0, 0)),  # W1..W4 (bf16)
                pl.BlockSpec((16, LATENT), lambda p, i: (0, 0)),            # packed vectors
            ],
            # Only pass 3 produces real data; collapse earlier passes onto block 0 so
            # no uninitialized output block is ever DMA'd back to HBM.
            out_specs=pl.BlockSpec((tb, 1),
                                   lambda p, i: (jnp.where(p == 3, i, 0), 0)),
            scratch_shapes=scratch,
        ),
        compiler_params=pltpu.CompilerParams(
            # Pass axis must be sequential; the batch-tile axis carries the BN-stat
            # accumulation, the activation cache and output revisits -> sequential too.
            dimension_semantics=("arbitrary", "arbitrary"),
            vmem_limit_bytes=vmem_limit,
        ),
    )(x, params["W"], params["vec"])
    return out[:b, 0]


# ----------------------------------------------------------------------------
# Parameter setup (plain-JAX glue): deterministic init + spectral normalization.
# ----------------------------------------------------------------------------
def _spectral_normalize(w, iters=30):
    # w has PyTorch layout (out_features, in_features). Power-iterate for sigma_max.
    u = jnp.ones((w.shape[0],), jnp.float32) / jnp.sqrt(jnp.float32(w.shape[0]))
    v = None
    for _ in range(iters):
        v = w.T @ u
        v = v / (jnp.linalg.norm(v) + 1e-12)
        u = w @ v
        u = u / (jnp.linalg.norm(u) + 1e-12)
    sigma = u @ (w @ v)
    return w / sigma


def _init_linear(key, fan_in, fan_out):
    # PyTorch nn.Linear default init: U(-1/sqrt(fan_in), 1/sqrt(fan_in)).
    kw, kb = jax.random.split(key)
    bound = 1.0 / jnp.sqrt(jnp.float32(fan_in))
    w = jax.random.uniform(kw, (fan_out, fan_in), jnp.float32, -bound, bound)
    b = jax.random.uniform(kb, (fan_out,), jnp.float32, -bound, bound)
    return w, b


def make_params(key, latent=LATENT):
    keys = jax.random.split(key, 5)
    ws, bs = [], []
    for idx, k in enumerate(keys):
        out_f = 1 if idx == 4 else latent
        w, b = _init_linear(k, latent, out_f)
        ws.append(_spectral_normalize(w))   # (out, in)
        bs.append(b)

    # Hidden weights pre-transposed to (in, out) so the kernel does x @ W; bf16 for MXU.
    W = jnp.stack([w.T for w in ws[:4]]).astype(jnp.bfloat16)        # (4, 128, 128)

    # One (16, 128) f32 slab for all small per-feature vectors (single DMA):
    #   rows 0-3: b1..b4 | rows 4-6: gamma1..3 | rows 7-9: beta1..3
    #   row 10: w5 head row (kept f32 for the VPU reduce) | row 11: b5 (broadcast)
    vec = jnp.zeros((16, latent), jnp.float32)
    vec = vec.at[0:4].set(jnp.stack(bs[:4]))
    vec = vec.at[4:7].set(jnp.ones((3, latent), jnp.float32))        # BN gammas
    vec = vec.at[7:10].set(jnp.zeros((3, latent), jnp.float32))      # BN betas
    vec = vec.at[10].set(ws[4].reshape(-1))
    vec = vec.at[11].set(jnp.full((latent,), bs[4][0], jnp.float32))
    return {"W": W, "vec": vec}


# ----------------------------------------------------------------------------
# Pure-JAX reference (f32 activations, bf16 MXU casts like the kernel).
# The cached kernel additionally rounds h1..h3 to bf16 when staging them in VMEM,
# so cached-path comparisons use a slightly looser tolerance.
# ----------------------------------------------------------------------------
def _reference_forward(x, params):
    W = params["W"]       # (4,128,128) bf16
    vec = params["vec"]   # (16,128)   f32

    def lin(h, k):
        return jnp.dot(h.astype(jnp.bfloat16), W[k],
                       preferred_element_type=jnp.float32) + vec[k]

    def lrelu(h):
        return jnp.maximum(h, LRELU_SLOPE * h)

    def bn(h, k):
        mu = h.mean(axis=0, keepdims=True)
        var = ((h - mu) ** 2).mean(axis=0, keepdims=True)
        return (h - mu) * jax.lax.rsqrt(var + BN_EPS) * vec[4 + k] + vec[7 + k]

    x = x.astype(jnp.float32)
    h = bn(lrelu(lin(x, 0)), 0)
    h = bn(lrelu(lin(h, 1)), 1)
    h = bn(lrelu(lin(h, 2)), 2)
    h = lrelu(lin(h, 3))
    return jnp.sum(h * vec[10], axis=-1) + vec[11, 0]


if __name__ == "__main__":
    key = jax.random.PRNGKey(0)
    k_params, k_x1, k_x2, k_x3 = jax.random.split(key, 4)

    params = make_params(k_params, LATENT)

    # Test 1: small batch, single tile, padded rows masked out of BN stats (cached path).
    x1 = jax.random.normal(k_x1, (8, LATENT), jnp.float32)
    out1 = jax.block_until_ready(text_latent_d_forward(x1, params))
    ref1 = _reference_forward(x1, params)
    assert out1.shape == (8,), out1.shape
    assert jnp.allclose(out1, ref1, atol=2e-2, rtol=2e-2), (out1, ref1)

    # Test 2: ragged batch across multiple tiles (cached path, mask on last tile only).
    x2 = jax.random.normal(k_x2, (20, LATENT), jnp.float32)
    out2 = jax.block_until_ready(text_latent_d_forward(x2, params, tile_b=16))
    ref2 = _reference_forward(x2, params)
    assert out2.shape == (20,), out2.shape
    assert jnp.allclose(out2, ref2, atol=2e-2, rtol=2e-2), (out2, ref2)

    # Test 3: force the recompute fallback (bf16 x re-stream path, multiple tiles).
    x3 = jax.random.normal(k_x3, (64, LATENT), jnp.float32)
    out3 = jax.block_until_ready(
        text_latent_d_forward(x3, params, tile_b=32, force_no_cache=True))
    ref3 = _reference_forward(x3, params)
    assert out3.shape == (64,), out3.shape
    assert jnp.allclose(out3, ref3, atol=1e-2, rtol=1e-2), (out3, ref3)

    print("KERNEL_OK")
</pallas_src>

<mosaic_0001>
module attributes {stable_mosaic.version = 11 : i64} {
  func.func @_text_latent_d_kernel(%arg0: i32, %arg1: i32, %arg2: memref<16x128xf32, #tpu.memory_space<vmem>>, %arg3: memref<4x128x128xbf16, #tpu.memory_space<vmem>>, %arg4: memref<16x128xf32, #tpu.memory_space<vmem>>, %arg5: memref<16x1xf32, #tpu.memory_space<vmem>>, %arg6: memref<8x128xf32, #tpu.memory_space<vmem>>, %arg7: memref<16x128xbf16, #tpu.memory_space<vmem>>) attributes {dimension_semantics = [#tpu.dimension_semantics<arbitrary>, #tpu.dimension_semantics<arbitrary>], iteration_bounds = array<i64: 4, 1>, scalar_prefetch = 0 : i64, scratch_operands = 2 : i64, tpu.core_type = #tpu.core_type<tc>, window_params = [{transform_indices = @transform_0, window_bounds = array<i64: 16, 128>}, {pipeline_mode = #tpu.pipeline_mode<synchronous>, transform_indices = @transform_1, window_bounds = array<i64: 4, 128, 128>}, {pipeline_mode = #tpu.pipeline_mode<synchronous>, transform_indices = @transform_2, window_bounds = array<i64: 16, 128>}, {transform_indices = @transform_3, window_bounds = array<i64: 16, 1>}]} {
    %c16_i32 = arith.constant 16 : i32
    %0 = arith.muli %arg1, %c16_i32 : i32
    %1 = tpu.assume_multiple %0, 16 : i32
    %c0_i32 = arith.constant 0 : i32
    %2 = arith.cmpi eq, %arg0, %c0_i32 : i32
    %3 = arith.extui %2 : i1 to i32
    %c0_i32_0 = arith.constant 0 : i32
    %4 = arith.cmpi ne, %3, %c0_i32_0 : i32
    scf.if %4 {
      %c0 = arith.constant 0 : index
      %c0_6 = arith.constant 0 : index
      %14 = vector.load %arg2[%c0, %c0_6] : memref<16x128xf32, #tpu.memory_space<vmem>>, vector<16x128xf32>
      %c0_7 = arith.constant 0 : index
      %c0_8 = arith.constant 0 : index
      %c0_9 = arith.constant 0 : index
      %15 = vector.load %arg3[%c0_7, %c0_8, %c0_9] : memref<4x128x128xbf16, #tpu.memory_space<vmem>>, vector<1x128x128xbf16>
      %16 = vector.shape_cast %15 : vector<1x128x128xbf16> to vector<128x128xbf16>
      %c0_10 = arith.constant 0 : index
      %c0_11 = arith.constant 0 : index
      %17 = vector.load %arg4[%c0_10, %c0_11] : memref<16x128xf32, #tpu.memory_space<vmem>>, vector<1x128xf32>
      %18 = arith.truncf %14 : vector<16x128xf32> to vector<16x128xbf16>
      %cst_12 = arith.constant dense<0.000000e+00> : vector<16x128xf32>
      %19 = tpu.matmul %18, %16, %cst_12 {dimension_numbers = #tpu.dot_dimension_numbers<[1], [0], [0], [1], [0, 0, 1, 1], [], []>} : vector<16x128xbf16>, vector<128x128xbf16>, vector<16x128xf32> -> vector<16x128xf32>
      %20 = vector.broadcast %17 : vector<1x128xf32> to vector<16x128xf32>
      %21 = arith.addf %19, %20 : vector<16x128xf32>
      %cst_13 = arith.constant 1.000000e-01 : f32
      %22 = vector.broadcast %cst_13 : f32 to vector<16x128xf32>
      %23 = arith.mulf %22, %21 : vector<16x128xf32>
      %24 = arith.maximumf %21, %23 : vector<16x128xf32>
      %c0_i32_14 = arith.constant 0 : i32
      %25 = arith.cmpi eq, %arg1, %c0_i32_14 : i32
      %26 = arith.extui %25 : i1 to i32
      %c0_i32_15 = arith.constant 0 : i32
      %27 = arith.cmpi ne, %26, %c0_i32_15 : i32
      scf.if %27 {
        %cst_21 = arith.constant 0.000000e+00 : f32
        %37 = vector.broadcast %cst_21 : f32 to vector<2x128xf32>
        %c0_22 = arith.constant 0 : index
        %c0_23 = arith.constant 0 : index
        %38 = vector.load %arg6[%c0_22, %c0_23] : memref<8x128xf32, #tpu.memory_space<vmem>>, vector<2x128xf32>
        tpu.vector_store %arg6[%c0_22, %c0_23], %37 {strides = array<i32>} : memref<8x128xf32, #tpu.memory_space<vmem>>, vector<2x128xf32>,
      } else {
      }
      %c0_i32_16 = arith.constant 0 : i32
      %28 = arith.cmpi eq, %arg1, %c0_i32_16 : i32
      %29 = arith.extui %28 : i1 to i32
      %c0_i32_17 = arith.constant 0 : i32
      %30 = arith.cmpi ne, %29, %c0_i32_17 : i32
      scf.if %30 {
        %37 = tpu.iota {dimensions = array<i32: 0>} : vector<16x1xi32>
        %c16_i32_21 = arith.constant 16 : i32
        %38 = arith.muli %arg1, %c16_i32_21 : i32
        %39 = vector.broadcast %38 : i32 to vector<16x1xi32>
        %40 = arith.addi %37, %39 : vector<16x1xi32>
        %c8_i32 = arith.constant 8 : i32
        %41 = vector.broadcast %c8_i32 : i32 to vector<16x1xi32>
        %42 = arith.cmpi slt, %40, %41 : vector<16x1xi32>
        %43 = arith.extui %42 : vector<16x1xi1> to vector<16x1xi32>
        %44 = arith.sitofp %43 : vector<16x1xi32> to vector<16x1xf32>
        %45 = vector.broadcast %44 : vector<16x1xf32> to vector<16x128xf32>
        %46 = arith.mulf %24, %45 : vector<16x128xf32>
        %47 = arith.mulf %24, %46 : vector<16x128xf32>
        %c0_22 = arith.constant 0 : index
        %c0_23 = arith.constant 0 : index
        %48 = vector.load %arg6[%c0_22, %c0_23] : memref<8x128xf32, #tpu.memory_space<vmem>>, vector<2x128xf32>
        %cst_24 = arith.constant dense<0.000000e+00> : vector<128xf32>
        %49 = vector.multi_reduction <add>, %46, %cst_24 [0] : vector<16x128xf32> to vector<128xf32>
        %50 = vector.shape_cast %49 : vector<128xf32> to vector<1x128xf32>
        %cst_25 = arith.constant dense<0.000000e+00> : vector<128xf32>
        %51 = vector.multi_reduction <add>, %47, %cst_25 [0] : vector<16x128xf32> to vector<128xf32>
        %52 = vector.shape_cast %51 : vector<128xf32> to vector<1x128xf32>
        %53 = tpu.concatenate %50, %52 in 0 : vector<1x128xf32>, vector<1x128xf32> -> vector<2x128xf32>
        %54 = arith.addf %48, %53 : vector<2x128xf32>
        %c0_26 = arith.constant 0 : index
        %c0_27 = arith.constant 0 : index
        %55 = vector.load %arg6[%c0_26, %c0_27] : memref<8x128xf32, #tpu.memory_space<vmem>>, vector<2x128xf32>
        tpu.vector_store %arg6[%c0_26, %c0_27], %54 {strides = array<i32>} : memref<8x128xf32, #tpu.memory_space<vmem>>, vector<2x128xf32>,
      } else {
      }
      %c0_i32_18 = arith.constant 0 : i32
      %31 = arith.cmpi ne, %arg1, %c0_i32_18 : i32
      %32 = arith.extui %31 : i1 to i32
      %c0_i32_19 = arith.constant 0 : i32
      %33 = arith.cmpi ne, %32, %c0_i32_19 : i32
      scf.if %33 {
        %37 = arith.mulf %24, %24 : vector<16x128xf32>
        %c0_21 = arith.constant 0 : index
        %c0_22 = arith.constant 0 : index
        %38 = vector.load %arg6[%c0_21, %c0_22] : memref<8x128xf32, #tpu.memory_space<vmem>>, vector<2x128xf32>
        %cst_23 = arith.constant dense<0.000000e+00> : vector<128xf32>
        %39 = vector.multi_reduction <add>, %24, %cst_23 [0] : vector<16x128xf32> to vector<128xf32>
        %40 = vector.shape_cast %39 : vector<128xf32> to vector<1x128xf32>
        %cst_24 = arith.constant dense<0.000000e+00> : vector<128xf32>
        %41 = vector.multi_reduction <add>, %37, %cst_24 [0] : vector<16x128xf32> to vector<128xf32>
        %42 = vector.shape_cast %41 : vector<128xf32> to vector<1x128xf32>
        %43 = tpu.concatenate %40, %42 in 0 : vector<1x128xf32>, vector<1x128xf32> -> vector<2x128xf32>
        %44 = arith.addf %38, %43 : vector<2x128xf32>
        %c0_25 = arith.constant 0 : index
        %c0_26 = arith.constant 0 : index
        %45 = vector.load %arg6[%c0_25, %c0_26] : memref<8x128xf32, #tpu.memory_space<vmem>>, vector<2x128xf32>
        tpu.vector_store %arg6[%c0_25, %c0_26], %44 {strides = array<i32>} : memref<8x128xf32, #tpu.memory_space<vmem>>, vector<2x128xf32>,
      } else {
      }
      %34 = arith.truncf %24 : vector<16x128xf32> to vector<16x128xbf16>
      %35 = arith.index_cast %1 : i32 to index
      %c0_20 = arith.constant 0 : index
      %36 = vector.load %arg7[%35, %c0_20] : memref<16x128xbf16, #tpu.memory_space<vmem>>, vector<16x128xbf16>
      tpu.vector_store %arg7[%35, %c0_20], %34 {strides = array<i32>} : memref<16x128xbf16, #tpu.memory_space<vmem>>, vector<16x128xbf16>,
    } else {
    }
    %c1_i32 = arith.constant 1 : i32
    %5 = arith.cmpi eq, %arg0, %c1_i32 : i32
    %6 = arith.extui %5 : i1 to i32
    %cst = arith.constant 1.250000e-01 : f32
    %c0_i32_1 = arith.constant 0 : i32
    %7 = arith.cmpi ne, %6, %c0_i32_1 : i32
    scf.if %7 {
      %c0_i32_6 = arith.constant 0 : i32
      %14 = arith.cmpi eq, %arg1, %c0_i32_6 : i32
      %15 = arith.extui %14 : i1 to i32
      %c0_i32_7 = arith.constant 0 : i32
      %16 = arith.cmpi ne, %15, %c0_i32_7 : i32
      scf.if %16 {
        %c4 = arith.constant 4 : index
        %c0_25 = arith.constant 0 : index
        %48 = vector.load %arg4[%c4, %c0_25] : memref<16x128xf32, #tpu.memory_space<vmem>>, vector<1x128xf32>
        %c7 = arith.constant 7 : index
        %c0_26 = arith.constant 0 : index
        %49 = vector.load %arg4[%c7, %c0_26] : memref<16x128xf32, #tpu.memory_space<vmem>>, vector<1x128xf32>
        %c0_27 = arith.constant 0 : index
        %c0_28 = arith.constant 0 : index
        %50 = vector.load %arg6[%c0_27, %c0_28] : memref<8x128xf32, #tpu.memory_space<vmem>>, vector<1x128xf32>
        %51 = vector.broadcast %cst : f32 to vector<1x128xf32>
        %52 = arith.mulf %50, %51 : vector<1x128xf32>
        %c1_29 = arith.constant 1 : index
        %c0_30 = arith.constant 0 : index
        %53 = vector.load %arg6[%c1_29, %c0_30] : memref<8x128xf32, #tpu.memory_space<vmem>>, vector<1x128xf32>
        %54 = vector.broadcast %cst : f32 to vector<1x128xf32>
        %55 = arith.mulf %53, %54 : vector<1x128xf32>
        %56 = arith.mulf %52, %52 : vector<1x128xf32>
        %57 = arith.subf %55, %56 : vector<1x128xf32>
        %cst_31 = arith.constant 0.000000e+00 : f32
        %58 = vector.broadcast %cst_31 : f32 to vector<1x128xf32>
        %59 = arith.maximumf %57, %58 : vector<1x128xf32>
        %cst_32 = arith.constant 9.99999974E-6 : f32
        %60 = vector.broadcast %cst_32 : f32 to vector<1x128xf32>
        %61 = arith.addf %59, %60 : vector<1x128xf32>
        %62 = math.rsqrt %61 : vector<1x128xf32>
        %63 = arith.mulf %48, %62 : vector<1x128xf32>
        %64 = arith.mulf %52, %63 : vector<1x128xf32>
        %65 = arith.subf %49, %64 : vector<1x128xf32>
        %66 = tpu.concatenate %63, %65 in 0 : vector<1x128xf32>, vector<1x128xf32> -> vector<2x128xf32>
        %c0_33 = arith.constant 0 : index
        %c0_34 = arith.constant 0 : index
        %67 = vector.load %arg6[%c0_33, %c0_34] : memref<8x128xf32, #tpu.memory_space<vmem>>, vector<2x128xf32>
        tpu.vector_store %arg6[%c0_33, %c0_34], %66 {strides = array<i32>} : memref<8x128xf32, #tpu.memory_space<vmem>>, vector<2x128xf32>,
      } else {
      }
      %17 = arith.index_cast %1 : i32 to index
      %c0 = arith.constant 0 : index
      %18 = vector.load %arg7[%17, %c0] : memref<16x128xbf16, #tpu.memory_space<vmem>>, vector<16x128xbf16>
      %19 = arith.extf %18 : vector<16x128xbf16> to vector<16x128xf32>
      %c0_8 = arith.constant 0 : index
      %c0_9 = arith.constant 0 : index
      %20 = vector.load %arg6[%c0_8, %c0_9] : memref<8x128xf32, #tpu.memory_space<vmem>>, vector<1x128xf32>
      %c1 = arith.constant 1 : index
      %c0_10 = arith.constant 0 : index
      %21 = vector.load %arg6[%c1, %c0_10] : memref<8x128xf32, #tpu.memory_space<vmem>>, vector<1x128xf32>
      %22 = vector.broadcast %20 : vector<1x128xf32> to vector<16x128xf32>
      %23 = arith.mulf %19, %22 : vector<16x128xf32>
      %24 = vector.broadcast %21 : vector<1x128xf32> to vector<16x128xf32>
      %25 = arith.addf %23, %24 : vector<16x128xf32>
      %c1_11 = arith.constant 1 : index
      %c0_12 = arith.constant 0 : index
      %c0_13 = arith.constant 0 : index
      %26 = vector.load %arg3[%c1_11, %c0_12, %c0_13] : memref<4x128x128xbf16, #tpu.memory_space<vmem>>, vector<1x128x128xbf16>
      %27 = vector.shape_cast %26 : vector<1x128x128xbf16> to vector<128x128xbf16>
      %c1_14 = arith.constant 1 : index
      %c0_15 = arith.constant 0 : index
      %28 = vector.load %arg4[%c1_14, %c0_15] : memref<16x128xf32, #tpu.memory_space<vmem>>, vector<1x128xf32>
      %29 = arith.truncf %25 : vector<16x128xf32> to vector<16x128xbf16>
      %cst_16 = arith.constant dense<0.000000e+00> : vector<16x128xf32>
      %30 = tpu.matmul %29, %27, %cst_16 {dimension_numbers = #tpu.dot_dimension_numbers<[1], [0], [0], [1], [0, 0, 1, 1], [], []>} : vector<16x128xbf16>, vector<128x128xbf16>, vector<16x128xf32> -> vector<16x128xf32>
      %31 = vector.broadcast %28 : vector<1x128xf32> to vector<16x128xf32>
      %32 = arith.addf %30, %31 : vector<16x128xf32>
      %cst_17 = arith.constant 1.000000e-01 : f32
      %33 = vector.broadcast %cst_17 : f32 to vector<16x128xf32>
      %34 = arith.mulf %33, %32 : vector<16x128xf32>
      %35 = arith.maximumf %32, %34 : vector<16x128xf32>
      %c0_i32_18 = arith.constant 0 : i32
      %36 = arith.cmpi eq, %arg1, %c0_i32_18 : i32
      %37 = arith.extui %36 : i1 to i32
      %c0_i32_19 = arith.constant 0 : i32
      %38 = arith.cmpi ne, %37, %c0_i32_19 : i32
      scf.if %38 {
        %cst_25 = arith.constant 0.000000e+00 : f32
        %48 = vector.broadcast %cst_25 : f32 to vector<2x128xf32>
        %c2 = arith.constant 2 : index
        %c0_26 = arith.constant 0 : index
        %49 = vector.load %arg6[%c2, %c0_26] : memref<8x128xf32, #tpu.memory_space<vmem>>, vector<2x128xf32>
        tpu.vector_store %arg6[%c2, %c0_26], %48 {strides = array<i32>} : memref<8x128xf32, #tpu.memory_space<vmem>>, vector<2x128xf32>,
      } else {
      }
      %c0_i32_20 = arith.constant 0 : i32
      %39 = arith.cmpi eq, %arg1, %c0_i32_20 : i32
      %40 = arith.extui %39 : i1 to i32
      %c0_i32_21 = arith.constant 0 : i32
      %41 = arith.cmpi ne, %40, %c0_i32_21 : i32
      scf.if %41 {
        %48 = tpu.iota {dimensions = array<i32: 0>} : vector<16x1xi32>
        %c16_i32_25 = arith.constant 16 : i32
        %49 = arith.muli %arg1, %c16_i32_25 : i32
        %50 = vector.broadcast %49 : i32 to vector<16x1xi32>
        %51 = arith.addi %48, %50 : vector<16x1xi32>
        %c8_i32 = arith.constant 8 : i32
        %52 = vector.broadcast %c8_i32 : i32 to vector<16x1xi32>
        %53 = arith.cmpi slt, %51, %52 : vector<16x1xi32>
        %54 = arith.extui %53 : vector<16x1xi1> to vector<16x1xi32>
        %55 = arith.sitofp %54 : vector<16x1xi32> to vector<16x1xf32>
        %56 = vector.broadcast %55 : vector<16x1xf32> to vector<16x128xf32>
        %57 = arith.mulf %35, %56 : vector<16x128xf32>
        %58 = arith.mulf %35, %57 : vector<16x128xf32>
        %c2 = arith.constant 2 : index
        %c0_26 = arith.constant 0 : index
        %59 = vector.load %arg6[%c2, %c0_26] : memref<8x128xf32, #tpu.memory_space<vmem>>, vector<2x128xf32>
        %cst_27 = arith.constant dense<0.000000e+00> : vector<128xf32>
        %60 = vector.multi_reduction <add>, %57, %cst_27 [0] : vector<16x128xf32> to vector<128xf32>
        %61 = vector.shape_cast %60 : vector<128xf32> to vector<1x128xf32>
        %cst_28 = arith.constant dense<0.000000e+00> : vector<128xf32>
        %62 = vector.multi_reduction <add>, %58, %cst_28 [0] : vector<16x128xf32> to vector<128xf32>
        %63 = vector.shape_cast %62 : vector<128xf32> to vector<1x128xf32>
        %64 = tpu.concatenate %61, %63 in 0 : vector<1x128xf32>, vector<1x128xf32> -> vector<2x128xf32>
        %65 = arith.addf %59, %64 : vector<2x128xf32>
        %c2_29 = arith.constant 2 : index
        %c0_30 = arith.constant 0 : index
        %66 = vector.load %arg6[%c2_29, %c0_30] : memref<8x128xf32, #tpu.memory_space<vmem>>, vector<2x128xf32>
        tpu.vector_store %arg6[%c2_29, %c0_30], %65 {strides = array<i32>} : memref<8x128xf32, #tpu.memory_space<vmem>>, vector<2x128xf32>,
      } else {
      }
      %c0_i32_22 = arith.constant 0 : i32
      %42 = arith.cmpi ne, %arg1, %c0_i32_22 : i32
      %43 = arith.extui %42 : i1 to i32
      %c0_i32_23 = arith.constant 0 : i32
      %44 = arith.cmpi ne, %43, %c0_i32_23 : i32
      scf.if %44 {
        %48 = arith.mulf %35, %35 : vector<16x128xf32>
        %c2 = arith.constant 2 : index
        %c0_25 = arith.constant 0 : index
        %49 = vector.load %arg6[%c2, %c0_25] : memref<8x128xf32, #tpu.memory_space<vmem>>, vector<2x128xf32>
        %cst_26 = arith.constant dense<0.000000e+00> : vector<128xf32>
        %50 = vector.multi_reduction <add>, %35, %cst_26 [0] : vector<16x128xf32> to vector<128xf32>
        %51 = vector.shape_cast %50 : vector<128xf32> to vector<1x128xf32>
        %cst_27 = arith.constant dense<0.000000e+00> : vector<128xf32>
        %52 = vector.multi_reduction <add>, %48, %cst_27 [0] : vector<16x128xf32> to vector<128xf32>
        %53 = vector.shape_cast %52 : vector<128xf32> to vector<1x128xf32>
        %54 = tpu.concatenate %51, %53 in 0 : vector<1x128xf32>, vector<1x128xf32> -> vector<2x128xf32>
        %55 = arith.addf %49, %54 : vector<2x128xf32>
        %c2_28 = arith.constant 2 : index
        %c0_29 = arith.constant 0 : index
        %56 = vector.load %arg6[%c2_28, %c0_29] : memref<8x128xf32, #tpu.memory_space<vmem>>, vector<2x128xf32>
        tpu.vector_store %arg6[%c2_28, %c0_29], %55 {strides = array<i32>} : memref<8x128xf32, #tpu.memory_space<vmem>>, vector<2x128xf32>,
      } else {
      }
      %45 = arith.truncf %35 : vector<16x128xf32> to vector<16x128xbf16>
      %46 = arith.index_cast %1 : i32 to index
      %c0_24 = arith.constant 0 : index
      %47 = vector.load %arg7[%46, %c0_24] : memref<16x128xbf16, #tpu.memory_space<vmem>>, vector<16x128xbf16>
      tpu.vector_store %arg7[%46, %c0_24], %45 {strides = array<i32>} : memref<16x128xbf16, #tpu.memory_space<vmem>>, vector<16x128xbf16>,
    } else {
    }
    %c2_i32 = arith.constant 2 : i32
    %8 = arith.cmpi eq, %arg0, %c2_i32 : i32
    %9 = arith.extui %8 : i1 to i32
    %cst_2 = arith.constant 1.250000e-01 : f32
    %c0_i32_3 = arith.constant 0 : i32
    %10 = arith.cmpi ne, %9, %c0_i32_3 : i32
    scf.if %10 {
      %c0_i32_6 = arith.constant 0 : i32
      %14 = arith.cmpi eq, %arg1, %c0_i32_6 : i32
      %15 = arith.extui %14 : i1 to i32
      %c0_i32_7 = arith.constant 0 : i32
      %16 = arith.cmpi ne, %15, %c0_i32_7 : i32
      scf.if %16 {
        %c5 = arith.constant 5 : index
        %c0_24 = arith.constant 0 : index
        %48 = vector.load %arg4[%c5, %c0_24] : memref<16x128xf32, #tpu.memory_space<vmem>>, vector<1x128xf32>
        %c8 = arith.constant 8 : index
        %c0_25 = arith.constant 0 : index
        %49 = vector.load %arg4[%c8, %c0_25] : memref<16x128xf32, #tpu.memory_space<vmem>>, vector<1x128xf32>
        %c2_26 = arith.constant 2 : index
        %c0_27 = arith.constant 0 : index
        %50 = vector.load %arg6[%c2_26, %c0_27] : memref<8x128xf32, #tpu.memory_space<vmem>>, vector<1x128xf32>
        %51 = vector.broadcast %cst_2 : f32 to vector<1x128xf32>
        %52 = arith.mulf %50, %51 : vector<1x128xf32>
        %c3_28 = arith.constant 3 : index
        %c0_29 = arith.constant 0 : index
        %53 = vector.load %arg6[%c3_28, %c0_29] : memref<8x128xf32, #tpu.memory_space<vmem>>, vector<1x128xf32>
        %54 = vector.broadcast %cst_2 : f32 to vector<1x128xf32>
        %55 = arith.mulf %53, %54 : vector<1x128xf32>
        %56 = arith.mulf %52, %52 : vector<1x128xf32>
        %57 = arith.subf %55, %56 : vector<1x128xf32>
        %cst_30 = arith.constant 0.000000e+00 : f32
        %58 = vector.broadcast %cst_30 : f32 to vector<1x128xf32>
        %59 = arith.maximumf %57, %58 : vector<1x128xf32>
        %cst_31 = arith.constant 9.99999974E-6 : f32
        %60 = vector.broadcast %cst_31 : f32 to vector<1x128xf32>
        %61 = arith.addf %59, %60 : vector<1x128xf32>
        %62 = math.rsqrt %61 : vector<1x128xf32>
        %63 = arith.mulf %48, %62 : vector<1x128xf32>
        %64 = arith.mulf %52, %63 : vector<1x128xf32>
        %65 = arith.subf %49, %64 : vector<1x128xf32>
        %66 = tpu.concatenate %63, %65 in 0 : vector<1x128xf32>, vector<1x128xf32> -> vector<2x128xf32>
        %c2_32 = arith.constant 2 : index
        %c0_33 = arith.constant 0 : index
        %67 = vector.load %arg6[%c2_32, %c0_33] : memref<8x128xf32, #tpu.memory_space<vmem>>, vector<2x128xf32>
        tpu.vector_store %arg6[%c2_32, %c0_33], %66 {strides = array<i32>} : memref<8x128xf32, #tpu.memory_space<vmem>>, vector<2x128xf32>,
      } else {
      }
      %17 = arith.index_cast %1 : i32 to index
      %c0 = arith.constant 0 : index
      %18 = vector.load %arg7[%17, %c0] : memref<16x128xbf16, #tpu.memory_space<vmem>>, vector<16x128xbf16>
      %19 = arith.extf %18 : vector<16x128xbf16> to vector<16x128xf32>
      %c2 = arith.constant 2 : index
      %c0_8 = arith.constant 0 : index
      %20 = vector.load %arg6[%c2, %c0_8] : memref<8x128xf32, #tpu.memory_space<vmem>>, vector<1x128xf32>
      %c3 = arith.constant 3 : index
      %c0_9 = arith.constant 0 : index
      %21 = vector.load %arg6[%c3, %c0_9] : memref<8x128xf32, #tpu.memory_space<vmem>>, vector<1x128xf32>
      %22 = vector.broadcast %20 : vector<1x128xf32> to vector<16x128xf32>
      %23 = arith.mulf %19, %22 : vector<16x128xf32>
      %24 = vector.broadcast %21 : vector<1x128xf32> to vector<16x128xf32>
      %25 = arith.addf %23, %24 : vector<16x128xf32>
      %c2_10 = arith.constant 2 : index
      %c0_11 = arith.constant 0 : index
      %c0_12 = arith.constant 0 : index
      %26 = vector.load %arg3[%c2_10, %c0_11, %c0_12] : memref<4x128x128xbf16, #tpu.memory_space<vmem>>, vector<1x128x128xbf16>
      %27 = vector.shape_cast %26 : vector<1x128x128xbf16> to vector<128x128xbf16>
      %c2_13 = arith.constant 2 : index
      %c0_14 = arith.constant 0 : index
      %28 = vector.load %arg4[%c2_13, %c0_14] : memref<16x128xf32, #tpu.memory_space<vmem>>, vector<1x128xf32>
      %29 = arith.truncf %25 : vector<16x128xf32> to vector<16x128xbf16>
      %cst_15 = arith.constant dense<0.000000e+00> : vector<16x128xf32>
      %30 = tpu.matmul %29, %27, %cst_15 {dimension_numbers = #tpu.dot_dimension_numbers<[1], [0], [0], [1], [0, 0, 1, 1], [], []>} : vector<16x128xbf16>, vector<128x128xbf16>, vector<16x128xf32> -> vector<16x128xf32>
      %31 = vector.broadcast %28 : vector<1x128xf32> to vector<16x128xf32>
      %32 = arith.addf %30, %31 : vector<16x128xf32>
      %cst_16 = arith.constant 1.000000e-01 : f32
      %33 = vector.broadcast %cst_16 : f32 to vector<16x128xf32>
      %34 = arith.mulf %33, %32 : vector<16x128xf32>
      %35 = arith.maximumf %32, %34 : vector<16x128xf32>
      %c0_i32_17 = arith.constant 0 : i32
      %36 = arith.cmpi eq, %arg1, %c0_i32_17 : i32
      %37 = arith.extui %36 : i1 to i32
      %c0_i32_18 = arith.constant 0 : i32
      %38 = arith.cmpi ne, %37, %c0_i32_18 : i32
      scf.if %38 {
        %cst_24 = arith.constant 0.000000e+00 : f32
        %48 = vector.broadcast %cst_24 : f32 to vector<2x128xf32>
        %c4 = arith.constant 4 : index
        %c0_25 = arith.constant 0 : index
        %49 = vector.load %arg6[%c4, %c0_25] : memref<8x128xf32, #tpu.memory_space<vmem>>, vector<2x128xf32>
        tpu.vector_store %arg6[%c4, %c0_25], %48 {strides = array<i32>} : memref<8x128xf32, #tpu.memory_space<vmem>>, vector<2x128xf32>,
      } else {
      }
      %c0_i32_19 = arith.constant 0 : i32
      %39 = arith.cmpi eq, %arg1, %c0_i32_19 : i32
      %40 = arith.extui %39 : i1 to i32
      %c0_i32_20 = arith.constant 0 : i32
      %41 = arith.cmpi ne, %40, %c0_i32_20 : i32
      scf.if %41 {
        %48 = tpu.iota {dimensions = array<i32: 0>} : vector<16x1xi32>
        %c16_i32_24 = arith.constant 16 : i32
        %49 = arith.muli %arg1, %c16_i32_24 : i32
        %50 = vector.broadcast %49 : i32 to vector<16x1xi32>
        %51 = arith.addi %48, %50 : vector<16x1xi32>
        %c8_i32 = arith.constant 8 : i32
        %52 = vector.broadcast %c8_i32 : i32 to vector<16x1xi32>
        %53 = arith.cmpi slt, %51, %52 : vector<16x1xi32>
        %54 = arith.extui %53 : vector<16x1xi1> to vector<16x1xi32>
        %55 = arith.sitofp %54 : vector<16x1xi32> to vector<16x1xf32>
        %56 = vector.broadcast %55 : vector<16x1xf32> to vector<16x128xf32>
        %57 = arith.mulf %35, %56 : vector<16x128xf32>
        %58 = arith.mulf %35, %57 : vector<16x128xf32>
        %c4 = arith.constant 4 : index
        %c0_25 = arith.constant 0 : index
        %59 = vector.load %arg6[%c4, %c0_25] : memref<8x128xf32, #tpu.memory_space<vmem>>, vector<2x128xf32>
        %cst_26 = arith.constant dense<0.000000e+00> : vector<128xf32>
        %60 = vector.multi_reduction <add>, %57, %cst_26 [0] : vector<16x128xf32> to vector<128xf32>
        %61 = vector.shape_cast %60 : vector<128xf32> to vector<1x128xf32>
        %cst_27 = arith.constant dense<0.000000e+00> : vector<128xf32>
        %62 = vector.multi_reduction <add>, %58, %cst_27 [0] : vector<16x128xf32> to vector<128xf32>
        %63 = vector.shape_cast %62 : vector<128xf32> to vector<1x128xf32>
        %64 = tpu.concatenate %61, %63 in 0 : vector<1x128xf32>, vector<1x128xf32> -> vector<2x128xf32>
        %65 = arith.addf %59, %64 : vector<2x128xf32>
        %c4_28 = arith.constant 4 : index
        %c0_29 = arith.constant 0 : index
        %66 = vector.load %arg6[%c4_28, %c0_29] : memref<8x128xf32, #tpu.memory_space<vmem>>, vector<2x128xf32>
        tpu.vector_store %arg6[%c4_28, %c0_29], %65 {strides = array<i32>} : memref<8x128xf32, #tpu.memory_space<vmem>>, vector<2x128xf32>,
      } else {
      }
      %c0_i32_21 = arith.constant 0 : i32
      %42 = arith.cmpi ne, %arg1, %c0_i32_21 : i32
      %43 = arith.extui %42 : i1 to i32
      %c0_i32_22 = arith.constant 0 : i32
      %44 = arith.cmpi ne, %43, %c0_i32_22 : i32
      scf.if %44 {
        %48 = arith.mulf %35, %35 : vector<16x128xf32>
        %c4 = arith.constant 4 : index
        %c0_24 = arith.constant 0 : index
        %49 = vector.load %arg6[%c4, %c0_24] : memref<8x128xf32, #tpu.memory_space<vmem>>, vector<2x128xf32>
        %cst_25 = arith.constant dense<0.000000e+00> : vector<128xf32>
        %50 = vector.multi_reduction <add>, %35, %cst_25 [0] : vector<16x128xf32> to vector<128xf32>
        %51 = vector.shape_cast %50 : vector<128xf32> to vector<1x128xf32>
        %cst_26 = arith.constant dense<0.000000e+00> : vector<128xf32>
        %52 = vector.multi_reduction <add>, %48, %cst_26 [0] : vector<16x128xf32> to vector<128xf32>
        %53 = vector.shape_cast %52 : vector<128xf32> to vector<1x128xf32>
        %54 = tpu.concatenate %51, %53 in 0 : vector<1x128xf32>, vector<1x128xf32> -> vector<2x128xf32>
        %55 = arith.addf %49, %54 : vector<2x128xf32>
        %c4_27 = arith.constant 4 : index
        %c0_28 = arith.constant 0 : index
        %56 = vector.load %arg6[%c4_27, %c0_28] : memref<8x128xf32, #tpu.memory_space<vmem>>, vector<2x128xf32>
        tpu.vector_store %arg6[%c4_27, %c0_28], %55 {strides = array<i32>} : memref<8x128xf32, #tpu.memory_space<vmem>>, vector<2x128xf32>,
      } else {
      }
      %45 = arith.truncf %35 : vector<16x128xf32> to vector<16x128xbf16>
      %46 = arith.index_cast %1 : i32 to index
      %c0_23 = arith.constant 0 : index
      %47 = vector.load %arg7[%46, %c0_23] : memref<16x128xbf16, #tpu.memory_space<vmem>>, vector<16x128xbf16>
      tpu.vector_store %arg7[%46, %c0_23], %45 {strides = array<i32>} : memref<16x128xbf16, #tpu.memory_space<vmem>>, vector<16x128xbf16>,
    } else {
    }
    %c3_i32 = arith.constant 3 : i32
    %11 = arith.cmpi eq, %arg0, %c3_i32 : i32
    %12 = arith.extui %11 : i1 to i32
    %cst_4 = arith.constant 1.250000e-01 : f32
    %c0_i32_5 = arith.constant 0 : i32
    %13 = arith.cmpi ne, %12, %c0_i32_5 : i32
    scf.if %13 {
      %c0_i32_6 = arith.constant 0 : i32
      %14 = arith.cmpi eq, %arg1, %c0_i32_6 : i32
      %15 = arith.extui %14 : i1 to i32
      %c0_i32_7 = arith.constant 0 : i32
      %16 = arith.cmpi ne, %15, %c0_i32_7 : i32
      scf.if %16 {
        %c6 = arith.constant 6 : index
        %c0_21 = arith.constant 0 : index
        %45 = vector.load %arg4[%c6, %c0_21] : memref<16x128xf32, #tpu.memory_space<vmem>>, vector<1x128xf32>
        %c9 = arith.constant 9 : index
        %c0_22 = arith.constant 0 : index
        %46 = vector.load %arg4[%c9, %c0_22] : memref<16x128xf32, #tpu.memory_space<vmem>>, vector<1x128xf32>
        %c4_23 = arith.constant 4 : index
        %c0_24 = arith.constant 0 : index
        %47 = vector.load %arg6[%c4_23, %c0_24] : memref<8x128xf32, #tpu.memory_space<vmem>>, vector<1x128xf32>
        %48 = vector.broadcast %cst_4 : f32 to vector<1x128xf32>
        %49 = arith.mulf %47, %48 : vector<1x128xf32>
        %c5_25 = arith.constant 5 : index
        %c0_26 = arith.constant 0 : index
        %50 = vector.load %arg6[%c5_25, %c0_26] : memref<8x128xf32, #tpu.memory_space<vmem>>, vector<1x128xf32>
        %51 = vector.broadcast %cst_4 : f32 to vector<1x128xf32>
        %52 = arith.mulf %50, %51 : vector<1x128xf32>
        %53 = arith.mulf %49, %49 : vector<1x128xf32>
        %54 = arith.subf %52, %53 : vector<1x128xf32>
        %cst_27 = arith.constant 0.000000e+00 : f32
        %55 = vector.broadcast %cst_27 : f32 to vector<1x128xf32>
        %56 = arith.maximumf %54, %55 : vector<1x128xf32>
        %cst_28 = arith.constant 9.99999974E-6 : f32
        %57 = vector.broadcast %cst_28 : f32 to vector<1x128xf32>
        %58 = arith.addf %56, %57 : vector<1x128xf32>
        %59 = math.rsqrt %58 : vector<1x128xf32>
        %60 = arith.mulf %45, %59 : vector<1x128xf32>
        %61 = arith.mulf %49, %60 : vector<1x128xf32>
        %62 = arith.subf %46, %61 : vector<1x128xf32>
        %63 = tpu.concatenate %60, %62 in 0 : vector<1x128xf32>, vector<1x128xf32> -> vector<2x128xf32>
        %c4_29 = arith.constant 4 : index
        %c0_30 = arith.constant 0 : index
        %64 = vector.load %arg6[%c4_29, %c0_30] : memref<8x128xf32, #tpu.memory_space<vmem>>, vector<2x128xf32>
        tpu.vector_store %arg6[%c4_29, %c0_30], %63 {strides = array<i32>} : memref<8x128xf32, #tpu.memory_space<vmem>>, vector<2x128xf32>,
      } else {
      }
      %17 = arith.index_cast %1 : i32 to index
      %c0 = arith.constant 0 : index
      %18 = vector.load %arg7[%17, %c0] : memref<16x128xbf16, #tpu.memory_space<vmem>>, vector<16x128xbf16>
      %19 = arith.extf %18 : vector<16x128xbf16> to vector<16x128xf32>
      %c4 = arith.constant 4 : index
      %c0_8 = arith.constant 0 : index
      %20 = vector.load %arg6[%c4, %c0_8] : memref<8x128xf32, #tpu.memory_space<vmem>>, vector<1x128xf32>
      %c5 = arith.constant 5 : index
      %c0_9 = arith.constant 0 : index
      %21 = vector.load %arg6[%c5, %c0_9] : memref<8x128xf32, #tpu.memory_space<vmem>>, vector<1x128xf32>
      %22 = vector.broadcast %20 : vector<1x128xf32> to vector<16x128xf32>
      %23 = arith.mulf %19, %22 : vector<16x128xf32>
      %24 = vector.broadcast %21 : vector<1x128xf32> to vector<16x128xf32>
      %25 = arith.addf %23, %24 : vector<16x128xf32>
      %c3 = arith.constant 3 : index
      %c0_10 = arith.constant 0 : index
      %c0_11 = arith.constant 0 : index
      %26 = vector.load %arg3[%c3, %c0_10, %c0_11] : memref<4x128x128xbf16, #tpu.memory_space<vmem>>, vector<1x128x128xbf16>
      %27 = vector.shape_cast %26 : vector<1x128x128xbf16> to vector<128x128xbf16>
      %c3_12 = arith.constant 3 : index
      %c0_13 = arith.constant 0 : index
      %28 = vector.load %arg4[%c3_12, %c0_13] : memref<16x128xf32, #tpu.memory_space<vmem>>, vector<1x128xf32>
      %29 = arith.truncf %25 : vector<16x128xf32> to vector<16x128xbf16>
      %cst_14 = arith.constant dense<0.000000e+00> : vector<16x128xf32>
      %30 = tpu.matmul %29, %27, %cst_14 {dimension_numbers = #tpu.dot_dimension_numbers<[1], [0], [0], [1], [0, 0, 1, 1], [], []>} : vector<16x128xbf16>, vector<128x128xbf16>, vector<16x128xf32> -> vector<16x128xf32>
      %31 = vector.broadcast %28 : vector<1x128xf32> to vector<16x128xf32>
      %32 = arith.addf %30, %31 : vector<16x128xf32>
      %cst_15 = arith.constant 1.000000e-01 : f32
      %33 = vector.broadcast %cst_15 : f32 to vector<16x128xf32>
      %34 = arith.mulf %33, %32 : vector<16x128xf32>
      %35 = arith.maximumf %32, %34 : vector<16x128xf32>
      %c10 = arith.constant 10 : index
      %c0_16 = arith.constant 0 : index
      %36 = vector.load %arg4[%c10, %c0_16] : memref<16x128xf32, #tpu.memory_space<vmem>>, vector<1x128xf32>
      %c11 = arith.constant 11 : index
      %c0_17 = arith.constant 0 : index
      %37 = vector.load %arg4[%c11, %c0_17] : memref<16x128xf32, #tpu.memory_space<vmem>>, vector<1x1xf32>
      %38 = vector.broadcast %36 : vector<1x128xf32> to vector<16x128xf32>
      %39 = arith.mulf %35, %38 : vector<16x128xf32>
      %cst_18 = arith.constant dense<0.000000e+00> : vector<16xf32>
      %40 = vector.multi_reduction <add>, %39, %cst_18 [1] : vector<16x128xf32> to vector<16xf32>
      %41 = vector.shape_cast %40 : vector<16xf32> to vector<16x1xf32>
      %42 = vector.broadcast %37 : vector<1x1xf32> to vector<16x1xf32>
      %43 = arith.addf %41, %42 : vector<16x1xf32>
      %c0_19 = arith.constant 0 : index
      %c0_20 = arith.constant 0 : index
      %44 = vector.load %arg5[%c0_19, %c0_20] : memref<16x1xf32, #tpu.memory_space<vmem>>, vector<16x1xf32>
      tpu.vector_store %arg5[%c0_19, %c0_20], %43 {strides = array<i32>} : memref<16x1xf32, #tpu.memory_space<vmem>>, vector<16x1xf32>,
    } else {
    }
    return
  }
  func.func @transform_0(%arg0: i32, %arg1: i32) -> (i32, i32) {
    %c0_i32 = arith.constant 0 : i32
    %0 = arith.cmpi eq, %arg0, %c0_i32 : i32
    %c0_i32_0 = arith.constant 0 : i32
    %1 = arith.select %0, %arg1, %c0_i32_0 : i32
    %c0_i32_1 = arith.constant 0 : i32
    %c0_i32_2 = arith.constant 0 : i32
    return %1, %c0_i32_1 : i32, i32
  }
  func.func @transform_1(%arg0: i32, %arg1: i32) -> (i32, i32, i32) {
    %c0_i32 = arith.constant 0 : i32
    %c0_i32_0 = arith.constant 0 : i32
    %c0_i32_1 = arith.constant 0 : i32
    %c0_i32_2 = arith.constant 0 : i32
    return %c0_i32, %c0_i32_0, %c0_i32_1 : i32, i32, i32
  }
  func.func @transform_2(%arg0: i32, %arg1: i32) -> (i32, i32) {
    %c0_i32 = arith.constant 0 : i32
    %c0_i32_0 = arith.constant 0 : i32
    %c0_i32_1 = arith.constant 0 : i32
    return %c0_i32, %c0_i32_0 : i32, i32
  }
  func.func @transform_3(%arg0: i32, %arg1: i32) -> (i32, i32) {
    %c3_i32 = arith.constant 3 : i32
    %0 = arith.cmpi eq, %arg0, %c3_i32 : i32
    %c0_i32 = arith.constant 0 : i32
    %1 = arith.select %0, %arg1, %c0_i32 : i32
    %c0_i32_0 = arith.constant 0 : i32
    %c0_i32_1 = arith.constant 0 : i32
    return %1, %c0_i32_0 : i32, i32
  }
}

</mosaic_0001>

<bundles_post_ra>
// kernel: tpu_custom_call.1
= control target key start
LH: loop header
LB: loop body
LE: loop exit
PB: predicated region body
PF: predicated region fallthrough
CT: control target
= control target key end

     0   :  { %8 = vsyncpa [#allocation5], 0  ;;  %s1776_s0 = inlined_call_operand.hbm [shape: f32[16,128], index: 0, kind: input, shape index: {}]   ;;  %s1777_s1 = inlined_call_operand.hbm [shape: bf16[4,128,128], index: 1, kind: input, shape index: {}]   ;;  %s1778_s2 = inlined_call_operand.hbm [shape: f32[16,128], index: 2, kind: input, shape index: {}]   ;;  %s1779_s3 = inlined_call_operand.vmem [shape: f32[16,1], index: 3, kind: output, shape index: {}]  }
   0x1   :  { %10 = vsyncpa [#allocation5 + $0x1], 0 }
   0x2   :  { %11 = vsyncpa [#allocation7], 0  ;;  %s1640_s12 = smov 0   ;;  %s1642_s13 = smov 0  }
   0x3   :  { %s1644_s14 = smov 0  }
   0x4 LB: > { %s1203_s15 = sadd.s32 4294967295, %s1603_s14   ;;  %s29_s16 = sadd.s32 1, %s1599_s13  ;;  %s1603_s14 = sphi %s1644_s14, %s17_s14   ;;  %s1599_s13 = sphi %s1642_s13, %s1791_s13   ;;  %s1595_s12 = sphi %s1640_s12, %s1790_s12  }
   0x5   : > { %p31_p0 = scmp.ge.s32.totalorder %s29_s16, 4  ;;  %p1205_p1 = scmp.ge.s32.totalorder %s1603_s14, 1 }
   0x6   : > { %p136_p2 = scmp.lt.s32.totalorder %s1603_s14, 5  ;;  %p1665_p4 = scmp.eq.s32.totalorder %s1203_s15, 0 }
   0x7   : > { %s1793_s16 = smov (%p31_p0, %s29_s16), 0  ;;  %s1605_s19 = smov [#allocation6]  }
   0x8   : > { %p1661_p3 = pnand %p1205_p1, %p136_p2  ;;  %s148_s20 = sshll.u32 %s1605_s19, 4  ;;  %s149_s20 = int_to_ptr.vmem [resolvable:$true] %s148_s20 }
   0x9   : > { %s1784_s18 = scalar_select %p1665_p4, 1, 0 }
   0xa   : > { %s1783_s17 = scalar_select %p1661_p3, 1, 0 }
   0xb   : > { %p1394_p5 = pneg %p1661_p3  ;;  %s1606_s22 = smov [#allocation8]  }
   0xc   : > { %s161_s23 = sshll.u32 %s1606_s22, 4  ;;  %s1489_s26 = scalar_lea.hbm %s1777_s1, 4096  ;;  %s162_s23 = int_to_ptr.vmem [resolvable:$true] %s161_s23 }
   0xd   : > { %p1673_p6 = pnand %p1665_p4, %p1394_p5  ;;  %p1490_p7 = scmp.ne.s32.totalorder %s1777_s1, %s1489_s26 }
   0xe   : > { %p1496_p11 = scmp.lt.u32.totalorder %s1489_s26, %s1777_s1 }
   0xf   : > { %p1491_p8 = pneg %p1673_p6 }
  0x11   : > { %p1492_p9 = pnand %p1491_p8, %p1490_p7 }
  0x13   : > { %p1493_p10 = pneg %p1492_p9 }
  0x15   : > { %p1498_p12 = pnand %p1496_p11, %p1493_p10 }
  0x17   : > { %1501 = shalt.err (!%p1498_p12)
}
  0x18   : > { %s1502_s4 = scalar_lea.vmem %s149_s20, 4096  ;;  %p1510_p2 = scmp.lt.s32.totalorder %s149_s20, %s149_s20 }
  0x19   : > { %p1503_p13 = scmp.ne.s32.totalorder %s149_s20, %s1502_s4  ;;  %p1511_p5 = scmp.lt.s32.totalorder %s1502_s4, %s1502_s4 }
  0x1b   : > { %p1505_p0 = pnand %p1503_p13, %p1491_p8  ;;  %p1512_p4 = por %p1511_p5, %p1510_p2 }
  0x1d   : > { %p1506_p1 = pneg %p1505_p0 }
  0x1f   : > { %p1513_p3 = pnand %p1512_p4, %p1506_p1 }
  0x21   : > { %1516 = shalt.err (!%p1513_p3)
}
  0x22   : > { %s1607_s5 = smov 64   ;;  %s1608_s6 = smov 4  }
  0x23   : > { %1397 = dma.hbm_to_vmem [thread:$0]  (!%p1673_p6), %s1777_s1, 4096, %s149_s20, [#allocation7], %s1607_s5, %s1607_s5, %s1608_s6  }
  0x24   : > { %s1517_s11 = scalar_lea.hbm %s1778_s2, 256 }
  0x25   : > { %p1518_p3 = scmp.ne.s32.totalorder %s1778_s2, %s1517_s11  ;;  %p1524_p10 = scmp.lt.u32.totalorder %s1517_s11, %s1778_s2 }
  0x27   : > { %p1520_p4 = pnand %p1518_p3, %p1491_p8 }
  0x29   : > { %p1521_p9 = pneg %p1520_p4 }
  0x2b   : > { %p1526_p11 = pnand %p1524_p10, %p1521_p9 }
  0x2d   : > { %1529 = shalt.err (!%p1526_p11)
}
  0x2e   : > { %s1530_s20 = scalar_lea.vmem %s162_s23, 256  ;;  %p1538_p1 = scmp.lt.s32.totalorder %s162_s23, %s162_s23 }
  0x2f   : > { %p1531_p12 = scmp.ne.s32.totalorder %s162_s23, %s1530_s20  ;;  %p1539_p2 = scmp.lt.s32.totalorder %s1530_s20, %s1530_s20 }
  0x31   : > { %p1533_p13 = pnand %p1531_p12, %p1491_p8  ;;  %p1540_p5 = por %p1539_p2, %p1538_p1 }
  0x33   : > { %p1534_p0 = pneg %p1533_p13 }
  0x35   : > { %p1541_p7 = pnand %p1540_p5, %p1534_p0 }
  0x37   : > { %1544 = shalt.err (!%p1541_p7)
}
  0x38   : > { %s1609_s25 = smov 128   ;;  %s1610_s26 = smov 8  }
  0x39   : > { %1400 = dma.hbm_to_vmem [thread:$0]  (!%p1673_p6), %s1778_s2, 256, %s162_s23, [#allocation7], %s1609_s25, %s1609_s25, %s1610_s26  }
  0x3a   : > { %p1408_p3 = scmp.eq.s32.totalorder %s1603_s14, 0  ;;  %s1611_s29 = smov [#allocation4]  }
  0x3b   : > { %s188_s30 = sshll.u32 %s1611_s29, 4  ;;  %p1786_p8 = scmp.lt.s32.totalorder %s1603_s14, 4  ;;  %s189_s30 = int_to_ptr.vmem [resolvable:$true] %s188_s30 }
  0x3c   : > { %s1545_s7 = scalar_lea.hbm %s1776_s0, 256 }
  0x3d   : > { %p1723_p4 = pnand %p1408_p3, %p1786_p8  ;;  %p1546_p7 = scmp.ne.s32.totalorder %s1776_s0, %s1545_s7 }
  0x3e   : > { %p1552_p11 = scmp.lt.u32.totalorder %s1545_s7, %s1776_s0 }
  0x3f   : > { %p1547_p6 = pneg %p1723_p4 }
  0x41   : > { %p1548_p9 = pnand %p1547_p6, %p1546_p7 }
  0x43   : > { %p1549_p10 = pneg %p1548_p9 }
  0x45   : > { %p1554_p12 = pnand %p1552_p11, %p1549_p10 }
  0x47   : > { %1557 = shalt.err (!%p1554_p12)
}
  0x48   : > { %s1558_s10 = scalar_lea.vmem %s189_s30, 256  ;;  %s1565_s11 = scalar_lea.vmem %s189_s30, 512 }
  0x49   : > { %p1559_p13 = scmp.ne.s32.totalorder %s189_s30, %s1558_s10  ;;  %p1566_p2 = scmp.lt.s32.totalorder %s189_s30, %s189_s30 }
  0x4a   : > { %p1567_p5 = scmp.lt.s32.totalorder %s1565_s11, %s1558_s10 }
  0x4b   : > { %p1561_p0 = pnand %p1559_p13, %p1547_p6 }
  0x4c   : > { %p1568_p3 = por %p1567_p5, %p1566_p2 }
  0x4d   : > { %p1562_p1 = pneg %p1561_p0 }
  0x4f   : > { %p1569_p8 = pnand %p1568_p3, %p1562_p1 }
  0x51   : > { %1572 = shalt.err (!%p1569_p8)
}
  0x52   : > { %1404 = dma.hbm_to_vmem [thread:$0]  (!%p1723_p4), %s1776_s0, 256, %s189_s30, [#allocation5], %s1609_s25, %s1609_s25, %s1610_s26  }
  0x53   : > { %p1788_p7 = scmp.ne.s32.totalorder %s1783_s17, 0 }
  0x54   : > { %p1789_p9 = scmp.ne.s32.totalorder (!%p1788_p7), %s1784_s18, 0 }
  0x55   : > { %200 = sbr.rel (%p1788_p7) target bundleno = 1377 (0x561), region = 32 }
  0x5c   : > { %1586 = dma.done.wait (%p1789_p9), [#allocation5], 256  }
  0x5d   : > { %1588 = vsyncadd (%p1789_p9), [#allocation5], 4294967040 }
  0x5e   : > { %1590 = dma.done.wait (%p1789_p9), [#allocation7], 4352  }
  0x5f   : > { %1592 = vsyncadd (%p1789_p9), [#allocation7], 4294962944  ;;  %p1214_p6 = scmp.ne.s32.totalorder %s1595_s12, 0 }
  0x60   : > { %v1451_v0 = vld [vmem:[#allocation6] sm:$0xff] (!%p1214_p6)   ;;  %v1612_v1 = vmov (!%p1214_p6), 0.0   ;;  %v1452_v2 = vld [vmem:[#allocation6 + $0x8] sm:$0xff] (!%p1214_p6)   ;;  %vm1613_vm0 = vmmov (!%p1214_p6), 0   ;;  %v1453_v3 = vld [vmem:[#allocation6 + $0x10] sm:$0xff] (!%p1214_p6)   ;;  %vm411_vm1 = vcmask (!%p1214_p6), 1040384  }
  0x61   : > { %257 = sbr.rel (%p1214_p6) target bundleno = 371 (0x173), region = 48  ;;  %1302 = vmatprep.subr.bf16.mxu0 (!%p1214_p6), %v1612_v1  ;;  %379 = vst [vmem:[#allocation2] sm:$0x3] (!%p1214_p6), %v1612_v1  ;;  %1318 = vmatprep.mubr.msk.bf16.mxu0 (!%p1214_p6), %vm1613_vm0, %v1612_v1  ;;  %v1454_v4 = vld [vmem:[#allocation6 + $0x18] sm:$0xff] (!%p1214_p6)   ;;  %v1455_v5 = vld [vmem:[#allocation6 + $0x20] sm:$0xff] (!%p1214_p6)   ;;  %v1456_v6 = vld [vmem:[#allocation6 + $0x28] sm:$0xff] (!%p1214_p6)  }
  0x62   : > { %1303 = vmatpush3.bf16.msra.mxu0 (!%p1214_p6), %v1451_v0  ;;  %v1457_v7 = vld [vmem:[#allocation6 + $0x30] sm:$0xff] (!%p1214_p6)   ;;  %v1458_v8 = vld [vmem:[#allocation6 + $0x38] sm:$0xff] (!%p1214_p6)   ;;  %v258_v9 = vld [vmem:[#allocation4] sm:$0xff] (!%p1214_p6) }
  0x63   : > { %1304 = vmatprep.subr.bf16.mxu0 (!%p1214_p6), %v1612_v1  ;;  %v259_v10 = vld [vmem:[#allocation4 + $0x8] sm:$0xff] (!%p1214_p6)  ;;  %v1215_v12 = vld [vmem:[#allocation8] ss:$0 sm:$0xff] (!%p1214_p6) }
  0x64   : > { %v277_v11 = vpack.c.bf16 (!%p1214_p6), %v259_v10, %v258_v9 }
  0x66   : > { %1305 = vmatpush3.bf16.msra.mxu0 (!%p1214_p6), %v1452_v2 }
  0x67   : > { %1306 = vmatprep.subr.bf16.mxu0 (!%p1214_p6), %v1612_v1 }
  0x68   : > { %v396_v39 = vld [vmem:[#allocation2] sm:$0x3] }
  0x6a   : > { %1307 = vmatpush3.bf16.msra.mxu0 %v1453_v3 }
  0x6b   : > { %1308 = vmatprep.subr.bf16.mxu0 %v1612_v1 }
  0x6e   : > { %1309 = vmatpush3.bf16.msra.mxu0 %v1454_v4 }
  0x6f   : > { %1310 = vmatprep.subr.bf16.mxu0 %v1612_v1 }
  0x72   : > { %1311 = vmatpush3.bf16.msra.mxu0 %v1455_v5 }
  0x73   : > { %1312 = vmatprep.subr.bf16.mxu0 %v1612_v1 }
  0x76   : > { %1313 = vmatpush3.bf16.msra.mxu0 %v1456_v6 }
  0x77   : > { %1314 = vmatprep.subr.bf16.mxu0 %v1612_v1 }
  0x7a   : > { %1315 = vmatpush3.bf16.msra.mxu0 %v1457_v7 }
  0x7b   : > { %1316 = vmatprep.subr.bf16.mxu0 %v1612_v1 }
  0x7e   : > { %1317 = vmatpush3.bf16.msra.mxu0 %v1458_v8 }
  0x81   : > { %1319 = vmatmul.mubr.bf16.vlgmr.msra.gmra.mrb[0].mxu0 %v277_v11 }
 0x154   : > { %v364_v13 = vpop.f32.mrb[0].mxu0 }
 0x155   : > { %v365_v14 = vadd.f32 %v1215_v12, %v364_v13  ;;  %v1320_v15 = vpop.f32.mrb[1].mxu0 }
 0x156   : > { %v367_v16 = vpop.f32.mrb[2].mxu0 }
 0x157   : > { %v371_v17 = vmul.f32 0.1, %v365_v14  ;;  %v368_v18 = vadd.f32 %v1215_v12, %v367_v16  ;;  %v1321_v19 = vpop.f32.mrb[3].mxu0 }
 0x159   : > { %v372_v20 = vmul.f32 0.1, %v368_v18  ;;  %v373_v21 = vmax.f32 %v365_v14, %v371_v17 }
 0x15b   : > { %v374_v22 = vmax.f32 %v368_v18, %v372_v20  ;;  %v394_v25 = vmul.f32 %v373_v21, %v373_v21 }
 0x15d   : > { %v393_v23 = vmul.f32 0.0, %v374_v22  ;;  %v440_v24 = vpack.c.bf16 %v374_v22, %v373_v21 }
 0x15f   : > { %v395_v26 = vmul.f32 %v393_v23, %v374_v22  ;;  %v397_v27 = vadd.f32 %v393_v23, %v373_v21  ;;  %445 = vst [vmem:[#allocation3] sm:$0xff] %v440_v24 }
 0x161   : > { %v398_v28 = vrot.slane %v397_v27, 4  ;;  %v404_v29 = vadd.f32 %v395_v26, %v394_v25 }
 0x163   : > { %v399_v30 = vadd.f32 %v398_v28, %v397_v27  ;;  %v405_v31 = vrot.slane %v404_v29, 4 }
 0x165   : > { %v400_v32 = vrot.slane %v399_v30, 2  ;;  %v406_v33 = vadd.f32 %v405_v31, %v404_v29 }
 0x167   : > { %v401_v34 = vadd.f32 %v400_v32, %v399_v30  ;;  %v407_v35 = vrot.slane %v406_v33, 2 }
 0x169   : > { %v402_v36 = vrot.slane %v401_v34, 1  ;;  %v408_v37 = vadd.f32 %v407_v35, %v406_v33 }
 0x16b   : > { %v409_v38 = vrot.slane %v408_v37, 1  ;;  %v403_v40 = vadd.f32 %v402_v36, %v401_v34 }
 0x16d   : > { %v410_v41 = vadd.f32 %v409_v38, %v408_v37 }
 0x16f   : > { %v412_v42 = vsel %vm411_vm1, %v403_v40, %v410_v41 }
 0x170   : > { %v413_v43 = vadd.f32 %v412_v42, %v396_v39 }
 0x172   : > { %414 = vst [vmem:[#allocation2] sm:$0x3] %v413_v43 }
 0x173 PF: > { %p1224_p4 = scmp.ne.s32.totalorder %s1595_s12, 1 }
 0x174   : > { %v1459_v44 = vld [vmem:[#allocation6 + $0x40] sm:$0xff] (!%p1224_p4)   ;;  %v1614_v45 = vmov (!%p1224_p4), 0.0   ;;  %v1460_v46 = vld [vmem:[#allocation6 + $0x48] sm:$0xff] (!%p1224_p4)   ;;  %vm1615_vm2 = vmmov (!%p1224_p4), 0   ;;  %v1461_v47 = vld [vmem:[#allocation6 + $0x50] sm:$0xff] (!%p1224_p4)   ;;  %vm471_vm3 = vcmask (!%p1224_p4), 1040384  }
 0x175   : > { %449 = sbr.rel (%p1224_p4) target bundleno = 664 (0x298), region = 60  ;;  %1322 = vmatprep.subr.bf16.mxu0 (!%p1224_p4), %v1614_v45  ;;  %614 = vst [vmem:[#allocation2 + $0x2] sm:$0x3] (!%p1224_p4), %v1614_v45  ;;  %1338 = vmatprep.mubr.msk.bf16.mxu0 (!%p1224_p4), %vm1615_vm2, %v1614_v45  ;;  %v1462_v51 = vld [vmem:[#allocation6 + $0x58] sm:$0xff] (!%p1224_p4)   ;;  %v1463_v55 = vld [vmem:[#allocation6 + $0x60] sm:$0xff] (!%p1224_p4)   ;;  %v1464_v58 = vld [vmem:[#allocation6 + $0x68] sm:$0xff] (!%p1224_p4)  }
 0x176   : > { %1323 = vmatpush3.bf16.msra.mxu0 (!%p1224_p4), %v1459_v44  ;;  %v1465_v59 = vld [vmem:[#allocation6 + $0x70] sm:$0xff] (!%p1224_p4)   ;;  %v1466_v60 = vld [vmem:[#allocation6 + $0x78] sm:$0xff] (!%p1224_p4)   ;;  %v454_v61 = vld [vmem:[#allocation8 + $0x4] sm:$0x1] (!%p1224_p4) }
 0x177   : > { %1324 = vmatprep.subr.bf16.mxu0 (!%p1224_p4), %v1614_v45  ;;  %v455_v0 = vld [vmem:[#allocation8 + $0x7] sm:$0x1] (!%p1224_p4)  ;;  %v478_v5 = vld [vmem:[#allocation3] sm:$0xff] (!%p1224_p4)  ;;  %v1227_v15 = vld [vmem:[#allocation8 + $0x1] ss:$0 sm:$0xff] (!%p1224_p4) }
 0x178   : > { %v479_v6 = vunpack.c.l.bf16 (!%p1224_p4), %v478_v5  ;;  %v480_v7 = vunpack.c.h.bf16 (!%p1224_p4), %v478_v5 }
 0x179   : > { %v456_v48 = vld [vmem:[#allocation2] sm:$0x1] (!%p1224_p4)  ;;  %v458_v50 = vld [vmem:[#allocation2 + $0x1] sm:$0x1] (!%p1224_p4) }
 0x17a   : > { %1325 = vmatpush3.bf16.msra.mxu0 (!%p1224_p4), %v1460_v46  ;;  %v457_v49 = vmul.f32 (!%p1224_p4), 0.125, %v456_v48  ;;  %v459_v52 = vmul.f32 (!%p1224_p4), 0.125, %v458_v50 }
 0x17b   : > { %1326 = vmatprep.subr.bf16.mxu0 (!%p1224_p4), %v1614_v45 }
 0x17c   : > { %v460_v53 = vmul.f32 %v457_v49, %v457_v49  ;;  %v631_v42 = vld [vmem:[#allocation2 + $0x2] sm:$0x3] }
 0x17e   : > { %1327 = vmatpush3.bf16.msra.mxu0 %v1461_v47  ;;  %v461_v54 = vsub.f32 %v459_v52, %v460_v53 }
 0x17f   : > { %1328 = vmatprep.subr.bf16.mxu0 %v1614_v45 }
 0x180   : > { %v462_v56 = vmax.f32 %v461_v54, 0.0 }
 0x182   : > { %1329 = vmatpush3.bf16.msra.mxu0 %v1462_v51  ;;  %v463_v57 = vadd.f32 1e-05, %v462_v56 }
 0x183   : > { %1330 = vmatprep.subr.bf16.mxu0 %v1614_v45 }
 0x184   : > { %1467 = vrsqrt.f32 %v463_v57 }
 0x186   : > { %1331 = vmatpush3.bf16.msra.mxu0 %v1463_v55 }
 0x187   : > { %1332 = vmatprep.subr.bf16.mxu0 %v1614_v45 }
 0x18a   : > { %1333 = vmatpush3.bf16.msra.mxu0 %v1464_v58 }
 0x18b   : > { %1334 = vmatprep.subr.bf16.mxu0 %v1614_v45 }
 0x18e   : > { %1335 = vmatpush3.bf16.msra.mxu0 %v1465_v59  ;;  %v1468_v62 = vpop.eup %1467 }
 0x18f   : > { %1336 = vmatprep.subr.bf16.mxu0 %v1614_v45  ;;  %v465_v63 = vmul.f32 %v1468_v62, %v454_v61 }
 0x191   : > { %v466_v1 = vmul.f32 %v465_v63, %v457_v49 }
 0x192   : > { %1337 = vmatpush3.bf16.msra.mxu0 %v1466_v60 }
 0x193   : > { %v467_v2 = vsub.f32 %v455_v0, %v466_v1 }
 0x195   : > { %v469_v3 = vrot.slane %v467_v2, 7 }
 0x197   : > { %v472_v4 = vsel %vm471_vm3, %v465_v63, %v469_v3 }
 0x198   : > { %473 = vst [vmem:[#allocation2] sm:$0x3] %v472_v4 }
 0x19f   : > { %v1225_v8 = vld [vmem:[#allocation2] ss:$0 sm:$0xff]  ;;  %v1226_v9 = vld [vmem:[#allocation2 + $0x1] ss:$0 sm:$0xff] }
 0x1a0   : > { %v487_v10 = vmul.f32 %v1225_v8, %v479_v6  ;;  %v488_v11 = vmul.f32 %v1225_v8, %v480_v7 }
 0x1a2   : > { %v493_v12 = vadd.f32 %v1226_v9, %v487_v10  ;;  %v494_v13 = vadd.f32 %v1226_v9, %v488_v11 }
 0x1a4   : > { %v513_v14 = vpack.c.bf16 %v494_v13, %v493_v12 }
 0x1a6   : > { %1339 = vmatmul.mubr.bf16.vlgmr.msra.gmra.mrb[0].mxu0 %v513_v14 }
 0x279   : > { %v600_v16 = vpop.f32.mrb[0].mxu0 }
 0x27a   : > { %v601_v17 = vadd.f32 %v1227_v15, %v600_v16  ;;  %v1340_v18 = vpop.f32.mrb[1].mxu0 }
 0x27b   : > { %v603_v19 = vpop.f32.mrb[2].mxu0 }
 0x27c   : > { %v607_v20 = vmul.f32 0.1, %v601_v17  ;;  %v604_v21 = vadd.f32 %v1227_v15, %v603_v19  ;;  %v1341_v22 = vpop.f32.mrb[3].mxu0 }
 0x27e   : > { %v608_v23 = vmul.f32 0.1, %v604_v21  ;;  %v609_v24 = vmax.f32 %v601_v17, %v607_v20 }
 0x280   : > { %v610_v25 = vmax.f32 %v604_v21, %v608_v23  ;;  %v629_v28 = vmul.f32 %v609_v24, %v609_v24 }
 0x282   : > { %v628_v26 = vmul.f32 0.0, %v610_v25  ;;  %v675_v27 = vpack.c.bf16 %v610_v25, %v609_v24 }
 0x284   : > { %v630_v29 = vmul.f32 %v628_v26, %v610_v25  ;;  %v632_v30 = vadd.f32 %v628_v26, %v609_v24  ;;  %676 = vst [vmem:[#allocation3] sm:$0xff] %v675_v27 }
 0x286   : > { %v633_v31 = vrot.slane %v632_v30, 4  ;;  %v639_v32 = vadd.f32 %v630_v29, %v629_v28 }
 0x288   : > { %v634_v33 = vadd.f32 %v633_v31, %v632_v30  ;;  %v640_v34 = vrot.slane %v639_v32, 4 }
 0x28a   : > { %v635_v35 = vrot.slane %v634_v33, 2  ;;  %v641_v36 = vadd.f32 %v640_v34, %v639_v32 }
 0x28c   : > { %v636_v37 = vadd.f32 %v635_v35, %v634_v33  ;;  %v642_v38 = vrot.slane %v641_v36, 2 }
 0x28e   : > { %v637_v39 = vrot.slane %v636_v37, 1  ;;  %v643_v40 = vadd.f32 %v642_v38, %v641_v36 }
 0x290   : > { %v644_v41 = vrot.slane %v643_v40, 1  ;;  %v638_v43 = vadd.f32 %v637_v39, %v636_v37 }
 0x292   : > { %v645_v44 = vadd.f32 %v644_v41, %v643_v40 }
 0x294   : > { %v647_v45 = vsel %vm471_vm3, %v638_v43, %v645_v44 }
 0x295   : > { %v648_v46 = vadd.f32 %v647_v45, %v631_v42 }
 0x297   : > { %649 = vst [vmem:[#allocation2 + $0x2] sm:$0x3] %v648_v46 }
 0x298 PF: > { %p1236_p10 = scmp.ne.s32.totalorder %s1595_s12, 2 }
 0x299   : > { %v1469_v47 = vld [vmem:[#allocation6 + $0x80] sm:$0xff] (!%p1236_p10)   ;;  %v1616_v48 = vmov (!%p1236_p10), 0.0   ;;  %v1470_v49 = vld [vmem:[#allocation6 + $0x88] sm:$0xff] (!%p1236_p10)   ;;  %vm1617_vm4 = vmmov (!%p1236_p10), 0   ;;  %v1471_v50 = vld [vmem:[#allocation6 + $0x90] sm:$0xff] (!%p1236_p10)   ;;  %vm702_vm5 = vcmask (!%p1236_p10), 1040384  }
 0x29a   : > { %680 = sbr.rel (%p1236_p10) target bundleno = 957 (0x3bd), region = 76  ;;  %1342 = vmatprep.subr.bf16.mxu0 (!%p1236_p10), %v1616_v48  ;;  %845 = vst [vmem:[#allocation2 + $0x4] sm:$0x3] (!%p1236_p10), %v1616_v48  ;;  %1358 = vmatprep.mubr.msk.bf16.mxu0 (!%p1236_p10), %vm1617_vm4, %v1616_v48  ;;  %v1472_v54 = vld [vmem:[#allocation6 + $0x98] sm:$0xff] (!%p1236_p10)   ;;  %v1473_v58 = vld [vmem:[#allocation6 + $0xa0] sm:$0xff] (!%p1236_p10)   ;;  %v1474_v61 = vld [vmem:[#allocation6 + $0xa8] sm:$0xff] (!%p1236_p10)  }
 0x29b   : > { %1343 = vmatpush3.bf16.msra.mxu0 (!%p1236_p10), %v1469_v47  ;;  %v1475_v62 = vld [vmem:[#allocation6 + $0xb0] sm:$0xff] (!%p1236_p10)   ;;  %v1476_v63 = vld [vmem:[#allocation6 + $0xb8] sm:$0xff] (!%p1236_p10)   ;;  %v685_v0 = vld [vmem:[#allocation8 + $0x5] sm:$0x1] (!%p1236_p10) }
 0x29c   : > { %1344 = vmatprep.subr.bf16.mxu0 (!%p1236_p10), %v1616_v48  ;;  %v686_v3 = vld [vmem:[#allocation8 + $0x8] sm:$0x1] (!%p1236_p10)  ;;  %v709_v8 = vld [vmem:[#allocation3] sm:$0xff] (!%p1236_p10)  ;;  %v1239_v18 = vld [vmem:[#allocation8 + $0x2] ss:$0 sm:$0xff] (!%p1236_p10) }
 0x29d   : > { %v710_v9 = vunpack.c.l.bf16 (!%p1236_p10), %v709_v8  ;;  %v711_v10 = vunpack.c.h.bf16 (!%p1236_p10), %v709_v8 }
 0x29e   : > { %v687_v51 = vld [vmem:[#allocation2 + $0x2] sm:$0x1] (!%p1236_p10)  ;;  %v689_v53 = vld [vmem:[#allocation2 + $0x3] sm:$0x1] (!%p1236_p10) }
 0x29f   : > { %1345 = vmatpush3.bf16.msra.mxu0 (!%p1236_p10), %v1470_v49  ;;  %v688_v52 = vmul.f32 (!%p1236_p10), 0.125, %v687_v51  ;;  %v690_v55 = vmul.f32 (!%p1236_p10), 0.125, %v689_v53 }
 0x2a0   : > { %1346 = vmatprep.subr.bf16.mxu0 (!%p1236_p10), %v1616_v48 }
 0x2a1   : > { %v691_v56 = vmul.f32 %v688_v52, %v688_v52  ;;  %v862_v45 = vld [vmem:[#allocation2 + $0x4] sm:$0x3] }
 0x2a3   : > { %1347 = vmatpush3.bf16.msra.mxu0 %v1471_v50  ;;  %v692_v57 = vsub.f32 %v690_v55, %v691_v56 }
 0x2a4   : > { %1348 = vmatprep.subr.bf16.mxu0 %v1616_v48 }
 0x2a5   : > { %v693_v59 = vmax.f32 %v692_v57, 0.0 }
 0x2a7   : > { %1349 = vmatpush3.bf16.msra.mxu0 %v1472_v54  ;;  %v694_v60 = vadd.f32 1e-05, %v693_v59 }
 0x2a8   : > { %1350 = vmatprep.subr.bf16.mxu0 %v1616_v48 }
 0x2a9   : > { %1477 = vrsqrt.f32 %v694_v60 }
 0x2ab   : > { %1351 = vmatpush3.bf16.msra.mxu0 %v1473_v58 }
 0x2ac   : > { %1352 = vmatprep.subr.bf16.mxu0 %v1616_v48 }
 0x2af   : > { %1353 = vmatpush3.bf16.msra.mxu0 %v1474_v61 }
 0x2b0   : > { %1354 = vmatprep.subr.bf16.mxu0 %v1616_v48 }
 0x2b3   : > { %1355 = vmatpush3.bf16.msra.mxu0 %v1475_v62  ;;  %v1478_v1 = vpop.eup %1477 }
 0x2b4   : > { %1356 = vmatprep.subr.bf16.mxu0 %v1616_v48  ;;  %v696_v2 = vmul.f32 %v1478_v1, %v685_v0 }
 0x2b6   : > { %v697_v4 = vmul.f32 %v696_v2, %v688_v52 }
 0x2b7   : > { %1357 = vmatpush3.bf16.msra.mxu0 %v1476_v63 }
 0x2b8   : > { %v698_v5 = vsub.f32 %v686_v3, %v697_v4 }
 0x2ba   : > { %v700_v6 = vrot.slane %v698_v5, 7 }
 0x2bc   : > { %v703_v7 = vsel %vm702_vm5, %v696_v2, %v700_v6 }
 0x2bd   : > { %704 = vst [vmem:[#allocation2 + $0x2] sm:$0x3] %v703_v7 }
 0x2c4   : > { %v1237_v11 = vld [vmem:[#allocation2 + $0x2] ss:$0 sm:$0xff]  ;;  %v1238_v12 = vld [vmem:[#allocation2 + $0x3] ss:$0 sm:$0xff] }
 0x2c5   : > { %v718_v13 = vmul.f32 %v1237_v11, %v710_v9  ;;  %v719_v14 = vmul.f32 %v1237_v11, %v711_v10 }
 0x2c7   : > { %v724_v15 = vadd.f32 %v1238_v12, %v718_v13  ;;  %v725_v16 = vadd.f32 %v1238_v12, %v719_v14 }
 0x2c9   : > { %v744_v17 = vpack.c.bf16 %v725_v16, %v724_v15 }
 0x2cb   : > { %1359 = vmatmul.mubr.bf16.vlgmr.msra.gmra.mrb[0].mxu0 %v744_v17 }
 0x39e   : > { %v831_v19 = vpop.f32.mrb[0].mxu0 }
 0x39f   : > { %v832_v20 = vadd.f32 %v1239_v18, %v831_v19  ;;  %v1360_v21 = vpop.f32.mrb[1].mxu0 }
 0x3a0   : > { %v834_v22 = vpop.f32.mrb[2].mxu0 }
 0x3a1   : > { %v838_v23 = vmul.f32 0.1, %v832_v20  ;;  %v835_v24 = vadd.f32 %v1239_v18, %v834_v22  ;;  %v1361_v25 = vpop.f32.mrb[3].mxu0 }
 0x3a3   : > { %v839_v26 = vmul.f32 0.1, %v835_v24  ;;  %v840_v27 = vmax.f32 %v832_v20, %v838_v23 }
 0x3a5   : > { %v841_v28 = vmax.f32 %v835_v24, %v839_v26  ;;  %v860_v31 = vmul.f32 %v840_v27, %v840_v27 }
 0x3a7   : > { %v859_v29 = vmul.f32 0.0, %v841_v28  ;;  %v906_v30 = vpack.c.bf16 %v841_v28, %v840_v27 }
 0x3a9   : > { %v861_v32 = vmul.f32 %v859_v29, %v841_v28  ;;  %v863_v33 = vadd.f32 %v859_v29, %v840_v27  ;;  %907 = vst [vmem:[#allocation3] sm:$0xff] %v906_v30 }
 0x3ab   : > { %v864_v34 = vrot.slane %v863_v33, 4  ;;  %v870_v35 = vadd.f32 %v861_v32, %v860_v31 }
 0x3ad   : > { %v865_v36 = vadd.f32 %v864_v34, %v863_v33  ;;  %v871_v37 = vrot.slane %v870_v35, 4 }
 0x3af   : > { %v866_v38 = vrot.slane %v865_v36, 2  ;;  %v872_v39 = vadd.f32 %v871_v37, %v870_v35 }
 0x3b1   : > { %v867_v40 = vadd.f32 %v866_v38, %v865_v36  ;;  %v873_v41 = vrot.slane %v872_v39, 2 }
 0x3b3   : > { %v868_v42 = vrot.slane %v867_v40, 1  ;;  %v874_v43 = vadd.f32 %v873_v41, %v872_v39 }
 0x3b5   : > { %v875_v44 = vrot.slane %v874_v43, 1  ;;  %v869_v46 = vadd.f32 %v868_v42, %v867_v40 }
 0x3b7   : > { %v876_v47 = vadd.f32 %v875_v44, %v874_v43 }
 0x3b9   : > { %v878_v48 = vsel %vm702_vm5, %v869_v46, %v876_v47 }
 0x3ba   : > { %v879_v49 = vadd.f32 %v878_v48, %v862_v45 }
 0x3bc   : > { %880 = vst [vmem:[#allocation2 + $0x4] sm:$0x3] %v879_v49 }
 0x3bd PF: > { %p1248_p11 = scmp.ne.s32.totalorder %s1595_s12, 3 }
 0x3be   : > { %v1479_v50 = vld [vmem:[#allocation6 + $0xc0] sm:$0xff] (!%p1248_p11)   ;;  %v1618_v51 = vmov (!%p1248_p11), 0.0   ;;  %v1480_v52 = vld [vmem:[#allocation6 + $0xc8] sm:$0xff] (!%p1248_p11)   ;;  %vm1619_vm6 = vmmov (!%p1248_p11), 0   ;;  %v1481_v53 = vld [vmem:[#allocation6 + $0xd0] sm:$0xff] (!%p1248_p11)   ;;  %vm933_vm7 = vcmask (!%p1248_p11), 1040384  }
 0x3bf   : > { %911 = sbr.rel (%p1248_p11) target bundleno = 1377 (0x561), region = 92  ;;  %1362 = vmatprep.subr.bf16.mxu0 (!%p1248_p11), %v1618_v51  ;;  %1378 = vmatprep.mubr.msk.bf16.mxu0 (!%p1248_p11), %vm1619_vm6, %v1618_v51  ;;  %v1482_v57 = vld [vmem:[#allocation6 + $0xd8] sm:$0xff] (!%p1248_p11)   ;;  %v1483_v61 = vld [vmem:[#allocation6 + $0xe0] sm:$0xff] (!%p1248_p11)   ;;  %v1484_v0 = vld [vmem:[#allocation6 + $0xe8] sm:$0xff] (!%p1248_p11)   ;;  %vm1091_vm8 = vcmask (!%p1248_p11), 7168  }
 0x3c0   : > { %1363 = vmatpush3.bf16.msra.mxu0 (!%p1248_p11), %v1479_v50  ;;  %v1485_v1 = vld [vmem:[#allocation6 + $0xf0] sm:$0xff] (!%p1248_p11)   ;;  %v1486_v2 = vld [vmem:[#allocation6 + $0xf8] sm:$0xff] (!%p1248_p11)   ;;  %v916_v3 = vld [vmem:[#allocation8 + $0x6] sm:$0x1] (!%p1248_p11) }
 0x3c1   : > { %1364 = vmatprep.subr.bf16.mxu0 (!%p1248_p11), %v1618_v51  ;;  %v917_v6 = vld [vmem:[#allocation8 + $0x9] sm:$0x1] (!%p1248_p11)  ;;  %v940_v11 = vld [vmem:[#allocation3] sm:$0xff] (!%p1248_p11)  ;;  %v1251_v21 = vld [vmem:[#allocation8 + $0x3] ss:$0 sm:$0xff] (!%p1248_p11) }
 0x3c2   : > { %v941_v12 = vunpack.c.l.bf16 (!%p1248_p11), %v940_v11  ;;  %v942_v13 = vunpack.c.h.bf16 (!%p1248_p11), %v940_v11  ;;  %v1260_v29 = vld [vmem:[#allocation8 + $0xa] ss:$0 sm:$0xff] (!%p1248_p11)  ;;  %v1261_v35 = vld [vmem:[#allocation8 + $0xb] ss:$0 sm:$0xff] (!%p1248_p11) }
 0x3c3   : > { %v918_v54 = vld [vmem:[#allocation2 + $0x4] sm:$0x1] (!%p1248_p11)  ;;  %v920_v56 = vld [vmem:[#allocation2 + $0x5] sm:$0x1] (!%p1248_p11) }
 0x3c4   : > { %1365 = vmatpush3.bf16.msra.mxu0 (!%p1248_p11), %v1480_v52  ;;  %v919_v55 = vmul.f32 (!%p1248_p11), 0.125, %v918_v54  ;;  %v921_v58 = vmul.f32 (!%p1248_p11), 0.125, %v920_v56 }
 0x3c5   : > { %1366 = vmatprep.subr.bf16.mxu0 (!%p1248_p11), %v1618_v51 }
 0x3c6   : > { %v922_v59 = vmul.f32 %v919_v55, %v919_v55 }
 0x3c8   : > { %1367 = vmatpush3.bf16.msra.mxu0 %v1481_v53  ;;  %v923_v60 = vsub.f32 %v921_v58, %v922_v59 }
 0x3c9   : > { %1368 = vmatprep.subr.bf16.mxu0 %v1618_v51 }
 0x3ca   : > { %v924_v62 = vmax.f32 %v923_v60, 0.0 }
 0x3cc   : > { %1369 = vmatpush3.bf16.msra.mxu0 %v1482_v57  ;;  %v925_v63 = vadd.f32 1e-05, %v924_v62 }
 0x3cd   : > { %1370 = vmatprep.subr.bf16.mxu0 %v1618_v51 }
 0x3ce   : > { %1487 = vrsqrt.f32 %v925_v63 }
 0x3d0   : > { %1371 = vmatpush3.bf16.msra.mxu0 %v1483_v61 }
 0x3d1   : > { %1372 = vmatprep.subr.bf16.mxu0 %v1618_v51 }
 0x3d4   : > { %1373 = vmatpush3.bf16.msra.mxu0 %v1484_v0 }
 0x3d5   : > { %1374 = vmatprep.subr.bf16.mxu0 %v1618_v51 }
 0x3d8   : > { %1375 = vmatpush3.bf16.msra.mxu0 %v1485_v1  ;;  %v1488_v4 = vpop.eup %1487 }
 0x3d9   : > { %1376 = vmatprep.subr.bf16.mxu0 %v1618_v51  ;;  %v927_v5 = vmul.f32 %v1488_v4, %v916_v3 }
 0x3db   : > { %v928_v7 = vmul.f32 %v927_v5, %v919_v55 }
 0x3dc   : > { %1377 = vmatpush3.bf16.msra.mxu0 %v1486_v2 }
 0x3dd   : > { %v929_v8 = vsub.f32 %v917_v6, %v928_v7 }
 0x3df   : > { %v931_v9 = vrot.slane %v929_v8, 7 }
 0x3e1   : > { %v934_v10 = vsel %vm933_vm7, %v927_v5, %v931_v9 }
 0x3e2   : > { %935 = vst [vmem:[#allocation2 + $0x4] sm:$0x3] %v934_v10 }
 0x3e9   : > { %v1249_v14 = vld [vmem:[#allocation2 + $0x4] ss:$0 sm:$0xff]  ;;  %v1250_v15 = vld [vmem:[#allocation2 + $0x5] ss:$0 sm:$0xff] }
 0x3ea   : > { %v949_v16 = vmul.f32 %v1249_v14, %v941_v12  ;;  %v950_v17 = vmul.f32 %v1249_v14, %v942_v13 }
 0x3ec   : > { %v955_v18 = vadd.f32 %v1250_v15, %v949_v16  ;;  %v956_v19 = vadd.f32 %v1250_v15, %v950_v17 }
 0x3ee   : > { %v975_v20 = vpack.c.bf16 %v956_v19, %v955_v18 }
 0x3f0   : > { %1379 = vmatmul.mubr.bf16.vlgmr.msra.gmra.mrb[0].mxu0 %v975_v20 }
 0x4c3   : > { %v1062_v22 = vpop.f32.mrb[0].mxu0 }
 0x4c4   : > { %v1063_v23 = vadd.f32 %v1251_v21, %v1062_v22  ;;  %v1380_v24 = vpop.f32.mrb[1].mxu0 }
 0x4c5   : > { %v1065_v25 = vpop.f32.mrb[2].mxu0 }
 0x4c6   : > { %v1069_v26 = vmul.f32 0.1, %v1063_v23  ;;  %v1066_v27 = vadd.f32 %v1251_v21, %v1065_v25  ;;  %v1381_v28 = vpop.f32.mrb[3].mxu0 }
 0x4c8   : > { %v1070_v30 = vmul.f32 0.1, %v1066_v27  ;;  %v1071_v31 = vmax.f32 %v1063_v23, %v1069_v26 }
 0x4ca   : > { %v1072_v32 = vmax.f32 %v1066_v27, %v1070_v30  ;;  %v1079_v33 = vmul.f32 %v1260_v29, %v1071_v31 }
 0x4cc   : > { %1081 = vadd.xlane.f32.xlu0 %v1079_v33  ;;  %v1080_v34 = vmul.f32 %v1260_v29, %v1072_v32 }
 0x4d0   : > { %1083 = vadd.xlane.f32.xlu0 %v1080_v34 }
 0x559   : > { %v1082_v36 = vpop.xlane.xlu0 %1081 }
 0x55a   : > { %v1089_v37 = vadd.f32 %v1261_v35, %v1082_v36 }
 0x55c   : > { %1092 = vst.msk [vmem:[%s1779_s3] sm:$0xff] %vm1091_vm8, %v1089_v37 }
 0x55d   : > { %v1084_v38 = vpop.xlane.xlu0 %1083 }
 0x55e   : > { %v1090_v39 = vadd.f32 %v1261_v35, %v1084_v38 }
 0x560   : > { %1093 = vst.msk [vmem:[%s1779_s3 + $0x8] sm:$0xff] %vm1091_vm8, %v1090_v39 }
 0x561 PF: > { %s17_s14 = sadd.s32 1, %s1603_s14   ;;  %s1790_s12 = smov %s1599_s13 }
 0x562   : > { %p14_p12 = scmp.ge.s32.totalorder %s17_s14, 6   ;;  %s1791_s13 = smov %s1793_s16 }
 0x564   :  { %16 = sbr.rel (!%p14_p12) target bundleno = 4 (0x4), region = 139 }
 0x56b   :  { %1122 = vsyncpa [#allocation5], 1 }
 0x56c   :  { %1124 = vsyncpa [#allocation5 + $0x1], 1 }
 0x56d   :  { %1125 = vsyncpa [#allocation7], 1 }

</bundles_post_ra>
